<compile_context>
chip_gen: v7x
topology: tpu7x:2x2x1
jax: 0.10.0
libtpu: 0.0.40
codegen_flags: <defaults>
</compile_context>

<pallas_src>
import functools

import jax
import jax.numpy as jnp
from jax import lax
from jax.experimental import pallas as pl
from jax.experimental.pallas import tpu as pltpu

_SQRT_HALF = 0.7071067811865476


# --------------------------- in-kernel helpers ------------------------------

def _layernorm(x, gamma, beta):
    # biased variance, eps=1e-5 -> matches torch.nn.LayerNorm
    mu = jnp.mean(x, axis=-1, keepdims=True)
    xc = x - mu
    var = jnp.mean(xc * xc, axis=-1, keepdims=True)
    return xc * lax.rsqrt(var + 1e-5) * gamma + beta


def _attention(q, k, v, n_heads, d_head, scratch_ref):
    """q:(N,H*D) (pre-scaled), k/v:(M,H*D). Writes each head's p@v into its
    static column slice of the VMEM scratch (no concatenate), returns (N,H*D) f32."""
    for h in range(n_heads):
        lo = h * d_head
        qh = q[:, lo:lo + d_head].astype(jnp.bfloat16)
        kh = k[:, lo:lo + d_head].astype(jnp.bfloat16)
        vh = v[:, lo:lo + d_head].astype(jnp.bfloat16)
        s = lax.dot_general(qh, kh, (((1,), (1,)), ((), ())),
                            preferred_element_type=jnp.float32)      # (N, M)
        m = jnp.max(s, axis=-1, keepdims=True)
        p = jnp.exp(s - m)
        p = p / jnp.sum(p, axis=-1, keepdims=True)
        scratch_ref[:, lo:lo + d_head] = jnp.dot(
            p.astype(jnp.bfloat16), vh, preferred_element_type=jnp.float32)
    return scratch_ref[...]


def _out_gcn(a_bf, attn, wo, bo):
    # output GCNConv: A_hat @ (attn @ Wo) + bo   (project first: d_in == d_out)
    proj = jnp.dot(attn.astype(jnp.bfloat16), wo,
                   preferred_element_type=jnp.float32)
    return jnp.dot(a_bf, proj.astype(jnp.bfloat16),
                   preferred_element_type=jnp.float32) + bo


def _ff_residual(h, a_bf, gamma, beta, wg, bg, wf, bff, d_ff):
    xn = _layernorm(h, gamma, beta)
    # GraphGeGLU GCN: d_out = 2*d_ff >> d_in -> aggregate first, then project.
    axn = jnp.dot(a_bf, xn.astype(jnp.bfloat16),
                  preferred_element_type=jnp.float32)
    y = jnp.dot(axn.astype(jnp.bfloat16), wg,
                preferred_element_type=jnp.float32) + bg
    val = y[:, :d_ff]                       # d_ff is a multiple of 128 -> aligned
    gate = y[:, d_ff:]
    gg = val * (0.5 * gate * (1.0 + lax.erf(gate * _SQRT_HALF)))   # exact GELU
    # output GCN: d_in = d_ff > d_out = C -> project first, then aggregate.
    proj = jnp.dot(gg.astype(jnp.bfloat16), wf,
                   preferred_element_type=jnp.float32)
    out = jnp.dot(a_bf, proj.astype(jnp.bfloat16),
                  preferred_element_type=jnp.float32) + bff
    return h + out


# ----------------------------- fused kernels --------------------------------

def _fused_self_kernel(x_ref, a_ref, g_ref, bln_ref,
                       wqkv_ref, bqkv_ref, wo_ref, bo_ref,
                       wg_ref, bg_ref, wf_ref, bff_ref,
                       o_ref, attn_scr, *, n_heads, d_head, d_ff):
    d_attn = n_heads * d_head
    a_bf = a_ref[...]                                    # bf16 (N, N)
    h = x_ref[0].astype(jnp.float32)                     # residual stream, f32
    for i in range(2):                                   # attn1, attn2
        xn = _layernorm(h, g_ref[i], bln_ref[i])
        axn = jnp.dot(a_bf, xn.astype(jnp.bfloat16),
                      preferred_element_type=jnp.float32)
        qkv = jnp.dot(axn.astype(jnp.bfloat16), wqkv_ref[i],
                      preferred_element_type=jnp.float32) + bqkv_ref[i]
        attn = _attention(qkv[:, :d_attn], qkv[:, d_attn:2 * d_attn],
                          qkv[:, 2 * d_attn:], n_heads, d_head, attn_scr)
        h = h + _out_gcn(a_bf, attn, wo_ref[i], bo_ref[i])
    h = _ff_residual(h, a_bf, g_ref[2], bln_ref[2],
                     wg_ref[...], bg_ref[...], wf_ref[...], bff_ref[...], d_ff)
    o_ref[0] = h.astype(o_ref.dtype)


def _fused_cross_kernel(x_ref, cond_ref, a_ref, g_ref, bln_ref,
                        wq_ref, bq_ref, wkv_ref, wo_ref, bo_ref,
                        wg_ref, bg_ref, wf_ref, bff_ref,
                        o_ref, attn_scr, *, n_heads, d_head, d_ff):
    d_attn = n_heads * d_head
    a_bf = a_ref[...]                                    # bf16 (N, N)
    cond_bf = cond_ref[0]                                # bf16 (M, d_cond)
    h = x_ref[0].astype(jnp.float32)
    for i in range(2):                                   # attn1, attn2
        xn = _layernorm(h, g_ref[i], bln_ref[i])
        axn = jnp.dot(a_bf, xn.astype(jnp.bfloat16),
                      preferred_element_type=jnp.float32)
        q = jnp.dot(axn.astype(jnp.bfloat16), wq_ref[i],
                    preferred_element_type=jnp.float32) + bq_ref[i]
        kv = jnp.dot(cond_bf, wkv_ref[i],                 # k_cond/v_cond: no bias
                     preferred_element_type=jnp.float32)  # (M, 2*d_attn)
        attn = _attention(q, kv[:, :d_attn], kv[:, d_attn:],
                          n_heads, d_head, attn_scr)
        h = h + _out_gcn(a_bf, attn, wo_ref[i], bo_ref[i])
    h = _ff_residual(h, a_bf, g_ref[2], bln_ref[2],
                     wg_ref[...], bg_ref[...], wf_ref[...], bff_ref[...], d_ff)
    o_ref[0] = h.astype(o_ref.dtype)


# ------------------------------ pallas_call wrapper --------------------------

def graph_transformer_block(pp, x, a_hat, cond, n_heads, d_head):
    """One fused pallas_call implementing x -> attn1 -> attn2 -> ff (with residuals)."""
    B, N, C = x.shape
    d_attn = n_heads * d_head
    d_ff = pp["ff_w"].shape[0]
    a_bf = a_hat.astype(jnp.bfloat16)
    out_shape = jax.ShapeDtypeStruct((B, N, C), jnp.float32)

    if cond is not None:
        M, d_cond = cond.shape[1], cond.shape[2]
        operands = (x, cond.astype(jnp.bfloat16), a_bf,
                    pp["gammas"], pp["betas"],
                    pp["wq"], pp["bq"], pp["wkv_cond"], pp["wo"], pp["bo"],
                    pp["geglu_w"], pp["geglu_b"], pp["ff_w"], pp["ff_b"])
        in_specs = [
            pl.BlockSpec((1, N, C), lambda b: (b, 0, 0)),
            pl.BlockSpec((1, M, d_cond), lambda b: (b, 0, 0)),
            pl.BlockSpec((N, N), lambda b: (0, 0)),
            pl.BlockSpec((3, C), lambda b: (0, 0)),
            pl.BlockSpec((3, C), lambda b: (0, 0)),
            pl.BlockSpec((2, C, d_attn), lambda b: (0, 0, 0)),
            pl.BlockSpec((2, d_attn), lambda b: (0, 0)),
            pl.BlockSpec((2, d_cond, 2 * d_attn), lambda b: (0, 0, 0)),
            pl.BlockSpec((2, d_attn, C), lambda b: (0, 0, 0)),
            pl.BlockSpec((2, C), lambda b: (0, 0)),
            pl.BlockSpec((C, 2 * d_ff), lambda b: (0, 0)),
            pl.BlockSpec((1, 2 * d_ff), lambda b: (0, 0)),
            pl.BlockSpec((d_ff, C), lambda b: (0, 0)),
            pl.BlockSpec((1, C), lambda b: (0, 0)),
        ]
        kern = functools.partial(_fused_cross_kernel, n_heads=n_heads,
                                 d_head=d_head, d_ff=d_ff)
        kv_len, proj_width = M, d_attn
    else:
        operands = (x, a_bf, pp["gammas"], pp["betas"],
                    pp["wqkv"], pp["bqkv"], pp["wo"], pp["bo"],
                    pp["geglu_w"], pp["geglu_b"], pp["ff_w"], pp["ff_b"])
        in_specs = [
            pl.BlockSpec((1, N, C), lambda b: (b, 0, 0)),
            pl.BlockSpec((N, N), lambda b: (0, 0)),
            pl.BlockSpec((3, C), lambda b: (0, 0)),
            pl.BlockSpec((3, C), lambda b: (0, 0)),
            pl.BlockSpec((2, C, 3 * d_attn), lambda b: (0, 0, 0)),
            pl.BlockSpec((2, 3 * d_attn), lambda b: (0, 0)),
            pl.BlockSpec((2, d_attn, C), lambda b: (0, 0, 0)),
            pl.BlockSpec((2, C), lambda b: (0, 0)),
            pl.BlockSpec((C, 2 * d_ff), lambda b: (0, 0)),
            pl.BlockSpec((1, 2 * d_ff), lambda b: (0, 0)),
            pl.BlockSpec((d_ff, C), lambda b: (0, 0)),
            pl.BlockSpec((1, C), lambda b: (0, 0)),
        ]
        kern = functools.partial(_fused_self_kernel, n_heads=n_heads,
                                 d_head=d_head, d_ff=d_ff)
        kv_len, proj_width = N, 3 * d_attn

    # Advisory cost (includes exp/erf/rsqrt transcendentals).
    flops = int(B * (2 * (4 * N * N * C + 2 * N * C * proj_width
                          + 4 * N * kv_len * d_attn + 2 * N * d_attn * C)
                     + 4 * N * N * C + 4 * N * C * d_ff + 2 * N * d_ff * C))
    trans = int(B * (2 * n_heads * N * kv_len + N * d_ff + 3 * N))
    bytes_acc = int(sum(a.size * a.dtype.itemsize for a in operands)
                    + B * N * C * 4)

    return pl.pallas_call(
        kern,
        out_shape=out_shape,
        grid=(B,),
        in_specs=in_specs,
        out_specs=pl.BlockSpec((1, N, C), lambda b: (b, 0, 0)),
        scratch_shapes=[pltpu.VMEM((N, d_attn), jnp.float32)],
        compiler_params=pltpu.CompilerParams(
            dimension_semantics=("parallel",)),      # B=2 -> both v7x TCs busy
        cost_estimate=pl.CostEstimate(flops=flops, transcendentals=trans,
                                      bytes_accessed=bytes_acc),
    )(*operands)


# ------------------------------- JAX glue -----------------------------------

def normalized_adjacency(edge_index, num_nodes):
    """Dense GCN-normalized adjacency with self-loops: D^-1/2 (A+I) D^-1/2."""
    src = edge_index[0]
    dst = edge_index[1]
    A = jnp.zeros((num_nodes, num_nodes), jnp.float32)
    A = A.at[dst, src].add(1.0)
    A = A + jnp.eye(num_nodes, dtype=jnp.float32)
    deg = jnp.sum(A, axis=1)
    d_inv_sqrt = jnp.where(deg > 0, 1.0 / jnp.sqrt(deg), 0.0)
    return A * d_inv_sqrt[:, None] * d_inv_sqrt[None, :]


def init_params(key, d_model, n_heads, d_head, d_cond):
    d_attn = n_heads * d_head
    d_ff = 4 * d_model
    keys = jax.random.split(key, 8)
    std = 0.02

    def w(k, shp):
        return jax.random.normal(k, shp, jnp.float32) * std

    def attn_params(ks):
        return {
            # Wq|Wk|Wv fused into one (d_model, 3*d_attn) weight; bias likewise.
            "wqkv": w(ks[0], (d_model, 3 * d_attn)),
            "bqkv": jnp.zeros((3 * d_attn,), jnp.float32),
            # Wk_cond|Wv_cond fused into one (d_cond, 2*d_attn) weight (bias=False).
            "wkv_cond": w(ks[1], (d_cond, 2 * d_attn)),
            "wo": w(ks[2], (d_attn, d_model)),
            "bo": jnp.zeros((d_model,), jnp.float32),
        }

    params = {
        "attn1": attn_params(keys[0:3]),
        "attn2": attn_params(keys[3:6]),
        "norm1_g": jnp.ones((d_model,), jnp.float32),
        "norm1_b": jnp.zeros((d_model,), jnp.float32),
        "norm2_g": jnp.ones((d_model,), jnp.float32),
        "norm2_b": jnp.zeros((d_model,), jnp.float32),
        "norm3_g": jnp.ones((d_model,), jnp.float32),
        "norm3_b": jnp.zeros((d_model,), jnp.float32),
        "geglu_w": w(keys[6], (d_model, 2 * d_ff)),
        "geglu_b": jnp.zeros((2 * d_ff,), jnp.float32),
        "out_w": w(keys[7], (d_ff, d_model)),
        "out_b": jnp.zeros((d_model,), jnp.float32),
    }
    # NOTE: self.ff in the PyTorch module is never used in forward(); its
    # parameters are intentionally not materialized. Dropout(0.0) is identity.
    return params


def prepare_params(params, n_heads, d_head):
    """Stack attn1/attn2 weights, fold 1/sqrt(d_head) into Q, cast weights to bf16."""
    d_attn = n_heads * d_head
    scale = d_head ** (-0.5)
    f32, bf = jnp.float32, jnp.bfloat16

    def prep_attn(p):
        wqkv = p["wqkv"].at[:, :d_attn].multiply(scale)   # scale folded into Q
        bqkv = p["bqkv"].at[:d_attn].multiply(scale)
        return wqkv, bqkv

    w1, b1 = prep_attn(params["attn1"])
    w2, b2 = prep_attn(params["attn2"])
    wqkv = jnp.stack([w1, w2])
    bqkv = jnp.stack([b1, b2])
    return {
        "gammas": jnp.stack([params["norm1_g"], params["norm2_g"],
                             params["norm3_g"]]).astype(f32),
        "betas": jnp.stack([params["norm1_b"], params["norm2_b"],
                            params["norm3_b"]]).astype(f32),
        "wqkv": wqkv.astype(bf),
        "bqkv": bqkv.astype(f32),
        "wq": wqkv[:, :, :d_attn].astype(bf),
        "bq": bqkv[:, :d_attn].astype(f32),
        "wkv_cond": jnp.stack([params["attn1"]["wkv_cond"],
                               params["attn2"]["wkv_cond"]]).astype(bf),
        "wo": jnp.stack([params["attn1"]["wo"],
                         params["attn2"]["wo"]]).astype(bf),
        "bo": jnp.stack([params["attn1"]["bo"],
                         params["attn2"]["bo"]]).astype(f32),
        "geglu_w": params["geglu_w"].astype(bf),
        "geglu_b": params["geglu_b"].reshape(1, -1).astype(f32),
        "ff_w": params["out_w"].astype(bf),
        "ff_b": params["out_b"].reshape(1, -1).astype(f32),
    }


if __name__ == "__main__":
    d_model, n_heads, d_head, d_cond = 32, 2, 16, 8
    B, N, M = 2, 16, 8

    root = jax.random.PRNGKey(0)
    k_par, k_x, k_cond = jax.random.split(root, 3)

    params = init_params(k_par, d_model, n_heads, d_head, d_cond)
    pp = prepare_params(params, n_heads, d_head)
    x = jax.random.normal(k_x, (B, N, d_model), jnp.float32)
    cond = jax.random.normal(k_cond, (B, M, d_cond), jnp.float32)

    # simple bidirectional ring graph on N nodes -> edge_index (2, 2N)
    src = jnp.concatenate([jnp.arange(N), (jnp.arange(N) + 1) % N])
    dst = jnp.concatenate([(jnp.arange(N) + 1) % N, jnp.arange(N)])
    edge_index = jnp.stack([src, dst]).astype(jnp.int32)
    a_hat = normalized_adjacency(edge_index, N)

    # cross-attention path (cond given, as in the PyTorch forward when cond!=None)
    fwd = jax.jit(functools.partial(graph_transformer_block,
                                    n_heads=n_heads, d_head=d_head))
    out = fwd(pp, x, a_hat, cond)
    jax.block_until_ready(out)
    assert out.shape == (B, N, d_model)

    # self-attention path (cond=None)
    fwd_self = jax.jit(functools.partial(graph_transformer_block, cond=None,
                                         n_heads=n_heads, d_head=d_head))
    out_self = fwd_self(pp, x, a_hat)
    jax.block_until_ready(out_self)
    assert out_self.shape == (B, N, d_model)

    print("KERNEL_OK")
</pallas_src>

<mosaic_0001>
module attributes {stable_mosaic.version = 11 : i64} {
  func.func @_fused_cross_kernel(%arg0: i32, %arg1: memref<1x16x32xf32, #tpu.memory_space<vmem>>, %arg2: memref<1x8x8xbf16, #tpu.memory_space<vmem>>, %arg3: memref<16x16xbf16, #tpu.memory_space<vmem>>, %arg4: memref<3x32xf32, #tpu.memory_space<vmem>>, %arg5: memref<3x32xf32, #tpu.memory_space<vmem>>, %arg6: memref<2x32x32xbf16, #tpu.memory_space<vmem>>, %arg7: memref<2x32xf32, #tpu.memory_space<vmem>>, %arg8: memref<2x8x64xbf16, #tpu.memory_space<vmem>>, %arg9: memref<2x32x32xbf16, #tpu.memory_space<vmem>>, %arg10: memref<2x32xf32, #tpu.memory_space<vmem>>, %arg11: memref<32x256xbf16, #tpu.memory_space<vmem>>, %arg12: memref<1x256xf32, #tpu.memory_space<vmem>>, %arg13: memref<128x32xbf16, #tpu.memory_space<vmem>>, %arg14: memref<1x32xf32, #tpu.memory_space<vmem>>, %arg15: memref<1x16x32xf32, #tpu.memory_space<vmem>>, %arg16: memref<16x32xf32, #tpu.memory_space<vmem>>) attributes {dimension_semantics = [#tpu.dimension_semantics<parallel>], iteration_bounds = array<i64: 2>, scalar_prefetch = 0 : i64, scratch_operands = 1 : i64, tpu.core_type = #tpu.core_type<tc>, window_params = [{transform_indices = @transform_0, window_bounds = array<i64: 1, 16, 32>}, {transform_indices = @transform_1, window_bounds = array<i64: 1, 8, 8>}, {pipeline_mode = #tpu.pipeline_mode<synchronous>, transform_indices = @transform_2, window_bounds = array<i64: 16, 16>}, {pipeline_mode = #tpu.pipeline_mode<synchronous>, transform_indices = @transform_3, window_bounds = array<i64: 3, 32>}, {pipeline_mode = #tpu.pipeline_mode<synchronous>, transform_indices = @transform_4, window_bounds = array<i64: 3, 32>}, {pipeline_mode = #tpu.pipeline_mode<synchronous>, transform_indices = @transform_5, window_bounds = array<i64: 2, 32, 32>}, {pipeline_mode = #tpu.pipeline_mode<synchronous>, transform_indices = @transform_6, window_bounds = array<i64: 2, 32>}, {pipeline_mode = #tpu.pipeline_mode<synchronous>, transform_indices = @transform_7, window_bounds = array<i64: 2, 8, 64>}, {pipeline_mode = #tpu.pipeline_mode<synchronous>, transform_indices = @transform_8, window_bounds = array<i64: 2, 32, 32>}, {pipeline_mode = #tpu.pipeline_mode<synchronous>, transform_indices = @transform_9, window_bounds = array<i64: 2, 32>}, {pipeline_mode = #tpu.pipeline_mode<synchronous>, transform_indices = @transform_10, window_bounds = array<i64: 32, 256>}, {pipeline_mode = #tpu.pipeline_mode<synchronous>, transform_indices = @transform_11, window_bounds = array<i64: 1, 256>}, {pipeline_mode = #tpu.pipeline_mode<synchronous>, transform_indices = @transform_12, window_bounds = array<i64: 128, 32>}, {pipeline_mode = #tpu.pipeline_mode<synchronous>, transform_indices = @transform_13, window_bounds = array<i64: 1, 32>}, {transform_indices = @transform_14, window_bounds = array<i64: 1, 16, 32>}]} {
    %c0 = arith.constant 0 : index
    %c0_0 = arith.constant 0 : index
    %0 = vector.load %arg3[%c0, %c0_0] : memref<16x16xbf16, #tpu.memory_space<vmem>>, vector<16x16xbf16>
    %c0_1 = arith.constant 0 : index
    %c0_2 = arith.constant 0 : index
    %c0_3 = arith.constant 0 : index
    %1 = vector.load %arg2[%c0_1, %c0_2, %c0_3] : memref<1x8x8xbf16, #tpu.memory_space<vmem>>, vector<1x8x8xbf16>
    %2 = vector.shape_cast %1 : vector<1x8x8xbf16> to vector<8x8xbf16>
    %c0_4 = arith.constant 0 : index
    %c0_5 = arith.constant 0 : index
    %c0_6 = arith.constant 0 : index
    %3 = vector.load %arg1[%c0_4, %c0_5, %c0_6] : memref<1x16x32xf32, #tpu.memory_space<vmem>>, vector<1x16x32xf32>
    %4 = vector.shape_cast %3 : vector<1x16x32xf32> to vector<16x32xf32>
    %c0_7 = arith.constant 0 : index
    %c0_8 = arith.constant 0 : index
    %5 = vector.load %arg4[%c0_7, %c0_8] : memref<3x32xf32, #tpu.memory_space<vmem>>, vector<1x32xf32>
    %6 = vector.shape_cast %5 : vector<1x32xf32> to vector<32xf32>
    %c0_9 = arith.constant 0 : index
    %c0_10 = arith.constant 0 : index
    %7 = vector.load %arg5[%c0_9, %c0_10] : memref<3x32xf32, #tpu.memory_space<vmem>>, vector<1x32xf32>
    %8 = vector.shape_cast %7 : vector<1x32xf32> to vector<32xf32>
    %cst = arith.constant dense<0.000000e+00> : vector<16xf32>
    %9 = vector.multi_reduction <add>, %4, %cst [1] : vector<16x32xf32> to vector<16xf32>
    %10 = vector.shape_cast %9 : vector<16xf32> to vector<16x1xf32>
    %cst_11 = arith.constant 3.200000e+01 : f32
    %11 = vector.broadcast %cst_11 : f32 to vector<16x1xf32>
    %12 = arith.divf %10, %11 : vector<16x1xf32>
    %13 = vector.broadcast %12 : vector<16x1xf32> to vector<16x32xf32>
    %14 = arith.subf %4, %13 : vector<16x32xf32>
    %15 = arith.mulf %14, %14 : vector<16x32xf32>
    %cst_12 = arith.constant dense<0.000000e+00> : vector<16xf32>
    %16 = vector.multi_reduction <add>, %15, %cst_12 [1] : vector<16x32xf32> to vector<16xf32>
    %17 = vector.shape_cast %16 : vector<16xf32> to vector<16x1xf32>
    %cst_13 = arith.constant 3.200000e+01 : f32
    %18 = vector.broadcast %cst_13 : f32 to vector<16x1xf32>
    %19 = arith.divf %17, %18 : vector<16x1xf32>
    %cst_14 = arith.constant 9.99999974E-6 : f32
    %20 = vector.broadcast %cst_14 : f32 to vector<16x1xf32>
    %21 = arith.addf %19, %20 : vector<16x1xf32>
    %22 = math.rsqrt %21 : vector<16x1xf32>
    %23 = vector.broadcast %22 : vector<16x1xf32> to vector<16x32xf32>
    %24 = arith.mulf %14, %23 : vector<16x32xf32>
    %25 = vector.shape_cast %6 : vector<32xf32> to vector<1x32xf32>
    %26 = vector.broadcast %25 : vector<1x32xf32> to vector<16x32xf32>
    %27 = arith.mulf %24, %26 : vector<16x32xf32>
    %28 = vector.shape_cast %8 : vector<32xf32> to vector<1x32xf32>
    %29 = vector.broadcast %28 : vector<1x32xf32> to vector<16x32xf32>
    %30 = arith.addf %27, %29 : vector<16x32xf32>
    %31 = arith.truncf %30 : vector<16x32xf32> to vector<16x32xbf16>
    %cst_15 = arith.constant dense<0.000000e+00> : vector<16x32xf32>
    %32 = tpu.matmul %0, %31, %cst_15 {dimension_numbers = #tpu.dot_dimension_numbers<[1], [0], [0], [1], [0, 0, 1, 1], [], []>} : vector<16x16xbf16>, vector<16x32xbf16>, vector<16x32xf32> -> vector<16x32xf32>
    %33 = arith.truncf %32 : vector<16x32xf32> to vector<16x32xbf16>
    %c0_16 = arith.constant 0 : index
    %c0_17 = arith.constant 0 : index
    %c0_18 = arith.constant 0 : index
    %34 = vector.load %arg6[%c0_16, %c0_17, %c0_18] : memref<2x32x32xbf16, #tpu.memory_space<vmem>>, vector<1x32x32xbf16>
    %35 = vector.shape_cast %34 : vector<1x32x32xbf16> to vector<32x32xbf16>
    %cst_19 = arith.constant dense<0.000000e+00> : vector<16x32xf32>
    %36 = tpu.matmul %33, %35, %cst_19 {dimension_numbers = #tpu.dot_dimension_numbers<[1], [0], [0], [1], [0, 0, 1, 1], [], []>} : vector<16x32xbf16>, vector<32x32xbf16>, vector<16x32xf32> -> vector<16x32xf32>
    %c0_20 = arith.constant 0 : index
    %c0_21 = arith.constant 0 : index
    %37 = vector.load %arg7[%c0_20, %c0_21] : memref<2x32xf32, #tpu.memory_space<vmem>>, vector<1x32xf32>
    %38 = vector.shape_cast %37 : vector<1x32xf32> to vector<32xf32>
    %39 = vector.shape_cast %38 : vector<32xf32> to vector<1x32xf32>
    %40 = vector.broadcast %39 : vector<1x32xf32> to vector<16x32xf32>
    %41 = arith.addf %36, %40 : vector<16x32xf32>
    %c0_22 = arith.constant 0 : index
    %c0_23 = arith.constant 0 : index
    %c0_24 = arith.constant 0 : index
    %42 = vector.load %arg8[%c0_22, %c0_23, %c0_24] : memref<2x8x64xbf16, #tpu.memory_space<vmem>>, vector<1x8x64xbf16>
    %43 = vector.shape_cast %42 : vector<1x8x64xbf16> to vector<8x64xbf16>
    %cst_25 = arith.constant dense<0.000000e+00> : vector<8x64xf32>
    %44 = tpu.matmul %2, %43, %cst_25 {dimension_numbers = #tpu.dot_dimension_numbers<[1], [0], [0], [1], [0, 0, 1, 1], [], []>} : vector<8x8xbf16>, vector<8x64xbf16>, vector<8x64xf32> -> vector<8x64xf32>
    %45 = vector.extract_strided_slice %44 {offsets = [0, 0], sizes = [8, 32], strides = [1, 1]} : vector<8x64xf32> to vector<8x32xf32>
    %46 = vector.extract_strided_slice %44 {offsets = [0, 32], sizes = [8, 32], strides = [1, 1]} : vector<8x64xf32> to vector<8x32xf32>
    %47 = vector.extract_strided_slice %41 {offsets = [0, 0], sizes = [16, 16], strides = [1, 1]} : vector<16x32xf32> to vector<16x16xf32>
    %48 = arith.truncf %47 : vector<16x16xf32> to vector<16x16xbf16>
    %49 = vector.extract_strided_slice %45 {offsets = [0, 0], sizes = [8, 16], strides = [1, 1]} : vector<8x32xf32> to vector<8x16xf32>
    %50 = arith.truncf %49 : vector<8x16xf32> to vector<8x16xbf16>
    %51 = vector.extract_strided_slice %46 {offsets = [0, 0], sizes = [8, 16], strides = [1, 1]} : vector<8x32xf32> to vector<8x16xf32>
    %52 = arith.truncf %51 : vector<8x16xf32> to vector<8x16xbf16>
    %cst_26 = arith.constant dense<0.000000e+00> : vector<16x8xf32>
    %53 = tpu.matmul %48, %50, %cst_26 {dimension_numbers = #tpu.dot_dimension_numbers<[1], [1], [0], [0], [0, 0, 1, 0], [], []>} : vector<16x16xbf16>, vector<8x16xbf16>, vector<16x8xf32> -> vector<16x8xf32>
    %cst_27 = arith.constant dense<0xFF800000> : vector<16xf32>
    %54 = vector.multi_reduction <maximumf>, %53, %cst_27 [1] : vector<16x8xf32> to vector<16xf32>
    %55 = vector.shape_cast %54 : vector<16xf32> to vector<16x1xf32>
    %56 = vector.broadcast %55 : vector<16x1xf32> to vector<16x8xf32>
    %57 = arith.subf %53, %56 : vector<16x8xf32>
    %58 = math.exp %57 : vector<16x8xf32>
    %cst_28 = arith.constant dense<0.000000e+00> : vector<16xf32>
    %59 = vector.multi_reduction <add>, %58, %cst_28 [1] : vector<16x8xf32> to vector<16xf32>
    %60 = vector.shape_cast %59 : vector<16xf32> to vector<16x1xf32>
    %61 = vector.broadcast %60 : vector<16x1xf32> to vector<16x8xf32>
    %62 = arith.divf %58, %61 : vector<16x8xf32>
    %63 = arith.truncf %62 : vector<16x8xf32> to vector<16x8xbf16>
    %cst_29 = arith.constant dense<0.000000e+00> : vector<16x16xf32>
    %64 = tpu.matmul %63, %52, %cst_29 {dimension_numbers = #tpu.dot_dimension_numbers<[1], [0], [0], [1], [0, 0, 1, 1], [], []>} : vector<16x8xbf16>, vector<8x16xbf16>, vector<16x16xf32> -> vector<16x16xf32>
    %c0_30 = arith.constant 0 : index
    %c0_31 = arith.constant 0 : index
    %65 = vector.load %arg16[%c0_30, %c0_31] : memref<16x32xf32, #tpu.memory_space<vmem>>, vector<16x16xf32>
    tpu.vector_store %arg16[%c0_30, %c0_31], %64 {strides = array<i32>} : memref<16x32xf32, #tpu.memory_space<vmem>>, vector<16x16xf32>,
    %66 = vector.extract_strided_slice %41 {offsets = [0, 16], sizes = [16, 16], strides = [1, 1]} : vector<16x32xf32> to vector<16x16xf32>
    %67 = arith.truncf %66 : vector<16x16xf32> to vector<16x16xbf16>
    %68 = vector.extract_strided_slice %45 {offsets = [0, 16], sizes = [8, 16], strides = [1, 1]} : vector<8x32xf32> to vector<8x16xf32>
    %69 = arith.truncf %68 : vector<8x16xf32> to vector<8x16xbf16>
    %70 = vector.extract_strided_slice %46 {offsets = [0, 16], sizes = [8, 16], strides = [1, 1]} : vector<8x32xf32> to vector<8x16xf32>
    %71 = arith.truncf %70 : vector<8x16xf32> to vector<8x16xbf16>
    %cst_32 = arith.constant dense<0.000000e+00> : vector<16x8xf32>
    %72 = tpu.matmul %67, %69, %cst_32 {dimension_numbers = #tpu.dot_dimension_numbers<[1], [1], [0], [0], [0, 0, 1, 0], [], []>} : vector<16x16xbf16>, vector<8x16xbf16>, vector<16x8xf32> -> vector<16x8xf32>
    %cst_33 = arith.constant dense<0xFF800000> : vector<16xf32>
    %73 = vector.multi_reduction <maximumf>, %72, %cst_33 [1] : vector<16x8xf32> to vector<16xf32>
    %74 = vector.shape_cast %73 : vector<16xf32> to vector<16x1xf32>
    %75 = vector.broadcast %74 : vector<16x1xf32> to vector<16x8xf32>
    %76 = arith.subf %72, %75 : vector<16x8xf32>
    %77 = math.exp %76 : vector<16x8xf32>
    %cst_34 = arith.constant dense<0.000000e+00> : vector<16xf32>
    %78 = vector.multi_reduction <add>, %77, %cst_34 [1] : vector<16x8xf32> to vector<16xf32>
    %79 = vector.shape_cast %78 : vector<16xf32> to vector<16x1xf32>
    %80 = vector.broadcast %79 : vector<16x1xf32> to vector<16x8xf32>
    %81 = arith.divf %77, %80 : vector<16x8xf32>
    %82 = arith.truncf %81 : vector<16x8xf32> to vector<16x8xbf16>
    %cst_35 = arith.constant dense<0.000000e+00> : vector<16x16xf32>
    %83 = tpu.matmul %82, %71, %cst_35 {dimension_numbers = #tpu.dot_dimension_numbers<[1], [0], [0], [1], [0, 0, 1, 1], [], []>} : vector<16x8xbf16>, vector<8x16xbf16>, vector<16x16xf32> -> vector<16x16xf32>
    %c0_36 = arith.constant 0 : index
    %c16 = arith.constant 16 : index
    %84 = vector.load %arg16[%c0_36, %c16] : memref<16x32xf32, #tpu.memory_space<vmem>>, vector<16x16xf32>
    tpu.vector_store %arg16[%c0_36, %c16], %83 {strides = array<i32>} : memref<16x32xf32, #tpu.memory_space<vmem>>, vector<16x16xf32>,
    %c0_37 = arith.constant 0 : index
    %c0_38 = arith.constant 0 : index
    %85 = vector.load %arg16[%c0_37, %c0_38] : memref<16x32xf32, #tpu.memory_space<vmem>>, vector<16x32xf32>
    %c0_39 = arith.constant 0 : index
    %c0_40 = arith.constant 0 : index
    %c0_41 = arith.constant 0 : index
    %86 = vector.load %arg9[%c0_39, %c0_40, %c0_41] : memref<2x32x32xbf16, #tpu.memory_space<vmem>>, vector<1x32x32xbf16>
    %87 = vector.shape_cast %86 : vector<1x32x32xbf16> to vector<32x32xbf16>
    %c0_42 = arith.constant 0 : index
    %c0_43 = arith.constant 0 : index
    %88 = vector.load %arg10[%c0_42, %c0_43] : memref<2x32xf32, #tpu.memory_space<vmem>>, vector<1x32xf32>
    %89 = vector.shape_cast %88 : vector<1x32xf32> to vector<32xf32>
    %90 = arith.truncf %85 : vector<16x32xf32> to vector<16x32xbf16>
    %cst_44 = arith.constant dense<0.000000e+00> : vector<16x32xf32>
    %91 = tpu.matmul %90, %87, %cst_44 {dimension_numbers = #tpu.dot_dimension_numbers<[1], [0], [0], [1], [0, 0, 1, 1], [], []>} : vector<16x32xbf16>, vector<32x32xbf16>, vector<16x32xf32> -> vector<16x32xf32>
    %92 = arith.truncf %91 : vector<16x32xf32> to vector<16x32xbf16>
    %cst_45 = arith.constant dense<0.000000e+00> : vector<16x32xf32>
    %93 = tpu.matmul %0, %92, %cst_45 {dimension_numbers = #tpu.dot_dimension_numbers<[1], [0], [0], [1], [0, 0, 1, 1], [], []>} : vector<16x16xbf16>, vector<16x32xbf16>, vector<16x32xf32> -> vector<16x32xf32>
    %94 = vector.shape_cast %89 : vector<32xf32> to vector<1x32xf32>
    %95 = vector.broadcast %94 : vector<1x32xf32> to vector<16x32xf32>
    %96 = arith.addf %93, %95 : vector<16x32xf32>
    %97 = arith.addf %4, %96 : vector<16x32xf32>
    %c1 = arith.constant 1 : index
    %c0_46 = arith.constant 0 : index
    %98 = vector.load %arg4[%c1, %c0_46] : memref<3x32xf32, #tpu.memory_space<vmem>>, vector<1x32xf32>
    %99 = vector.shape_cast %98 : vector<1x32xf32> to vector<32xf32>
    %c1_47 = arith.constant 1 : index
    %c0_48 = arith.constant 0 : index
    %100 = vector.load %arg5[%c1_47, %c0_48] : memref<3x32xf32, #tpu.memory_space<vmem>>, vector<1x32xf32>
    %101 = vector.shape_cast %100 : vector<1x32xf32> to vector<32xf32>
    %cst_49 = arith.constant dense<0.000000e+00> : vector<16xf32>
    %102 = vector.multi_reduction <add>, %97, %cst_49 [1] : vector<16x32xf32> to vector<16xf32>
    %103 = vector.shape_cast %102 : vector<16xf32> to vector<16x1xf32>
    %cst_50 = arith.constant 3.200000e+01 : f32
    %104 = vector.broadcast %cst_50 : f32 to vector<16x1xf32>
    %105 = arith.divf %103, %104 : vector<16x1xf32>
    %106 = vector.broadcast %105 : vector<16x1xf32> to vector<16x32xf32>
    %107 = arith.subf %97, %106 : vector<16x32xf32>
    %108 = arith.mulf %107, %107 : vector<16x32xf32>
    %cst_51 = arith.constant dense<0.000000e+00> : vector<16xf32>
    %109 = vector.multi_reduction <add>, %108, %cst_51 [1] : vector<16x32xf32> to vector<16xf32>
    %110 = vector.shape_cast %109 : vector<16xf32> to vector<16x1xf32>
    %cst_52 = arith.constant 3.200000e+01 : f32
    %111 = vector.broadcast %cst_52 : f32 to vector<16x1xf32>
    %112 = arith.divf %110, %111 : vector<16x1xf32>
    %cst_53 = arith.constant 9.99999974E-6 : f32
    %113 = vector.broadcast %cst_53 : f32 to vector<16x1xf32>
    %114 = arith.addf %112, %113 : vector<16x1xf32>
    %115 = math.rsqrt %114 : vector<16x1xf32>
    %116 = vector.broadcast %115 : vector<16x1xf32> to vector<16x32xf32>
    %117 = arith.mulf %107, %116 : vector<16x32xf32>
    %118 = vector.shape_cast %99 : vector<32xf32> to vector<1x32xf32>
    %119 = vector.broadcast %118 : vector<1x32xf32> to vector<16x32xf32>
    %120 = arith.mulf %117, %119 : vector<16x32xf32>
    %121 = vector.shape_cast %101 : vector<32xf32> to vector<1x32xf32>
    %122 = vector.broadcast %121 : vector<1x32xf32> to vector<16x32xf32>
    %123 = arith.addf %120, %122 : vector<16x32xf32>
    %124 = arith.truncf %123 : vector<16x32xf32> to vector<16x32xbf16>
    %cst_54 = arith.constant dense<0.000000e+00> : vector<16x32xf32>
    %125 = tpu.matmul %0, %124, %cst_54 {dimension_numbers = #tpu.dot_dimension_numbers<[1], [0], [0], [1], [0, 0, 1, 1], [], []>} : vector<16x16xbf16>, vector<16x32xbf16>, vector<16x32xf32> -> vector<16x32xf32>
    %126 = arith.truncf %125 : vector<16x32xf32> to vector<16x32xbf16>
    %c1_55 = arith.constant 1 : index
    %c0_56 = arith.constant 0 : index
    %c0_57 = arith.constant 0 : index
    %127 = vector.load %arg6[%c1_55, %c0_56, %c0_57] : memref<2x32x32xbf16, #tpu.memory_space<vmem>>, vector<1x32x32xbf16>
    %128 = vector.shape_cast %127 : vector<1x32x32xbf16> to vector<32x32xbf16>
    %cst_58 = arith.constant dense<0.000000e+00> : vector<16x32xf32>
    %129 = tpu.matmul %126, %128, %cst_58 {dimension_numbers = #tpu.dot_dimension_numbers<[1], [0], [0], [1], [0, 0, 1, 1], [], []>} : vector<16x32xbf16>, vector<32x32xbf16>, vector<16x32xf32> -> vector<16x32xf32>
    %c1_59 = arith.constant 1 : index
    %c0_60 = arith.constant 0 : index
    %130 = vector.load %arg7[%c1_59, %c0_60] : memref<2x32xf32, #tpu.memory_space<vmem>>, vector<1x32xf32>
    %131 = vector.shape_cast %130 : vector<1x32xf32> to vector<32xf32>
    %132 = vector.shape_cast %131 : vector<32xf32> to vector<1x32xf32>
    %133 = vector.broadcast %132 : vector<1x32xf32> to vector<16x32xf32>
    %134 = arith.addf %129, %133 : vector<16x32xf32>
    %c1_61 = arith.constant 1 : index
    %c0_62 = arith.constant 0 : index
    %c0_63 = arith.constant 0 : index
    %135 = vector.load %arg8[%c1_61, %c0_62, %c0_63] : memref<2x8x64xbf16, #tpu.memory_space<vmem>>, vector<1x8x64xbf16>
    %136 = vector.shape_cast %135 : vector<1x8x64xbf16> to vector<8x64xbf16>
    %cst_64 = arith.constant dense<0.000000e+00> : vector<8x64xf32>
    %137 = tpu.matmul %2, %136, %cst_64 {dimension_numbers = #tpu.dot_dimension_numbers<[1], [0], [0], [1], [0, 0, 1, 1], [], []>} : vector<8x8xbf16>, vector<8x64xbf16>, vector<8x64xf32> -> vector<8x64xf32>
    %138 = vector.extract_strided_slice %137 {offsets = [0, 0], sizes = [8, 32], strides = [1, 1]} : vector<8x64xf32> to vector<8x32xf32>
    %139 = vector.extract_strided_slice %137 {offsets = [0, 32], sizes = [8, 32], strides = [1, 1]} : vector<8x64xf32> to vector<8x32xf32>
    %140 = vector.extract_strided_slice %134 {offsets = [0, 0], sizes = [16, 16], strides = [1, 1]} : vector<16x32xf32> to vector<16x16xf32>
    %141 = arith.truncf %140 : vector<16x16xf32> to vector<16x16xbf16>
    %142 = vector.extract_strided_slice %138 {offsets = [0, 0], sizes = [8, 16], strides = [1, 1]} : vector<8x32xf32> to vector<8x16xf32>
    %143 = arith.truncf %142 : vector<8x16xf32> to vector<8x16xbf16>
    %144 = vector.extract_strided_slice %139 {offsets = [0, 0], sizes = [8, 16], strides = [1, 1]} : vector<8x32xf32> to vector<8x16xf32>
    %145 = arith.truncf %144 : vector<8x16xf32> to vector<8x16xbf16>
    %cst_65 = arith.constant dense<0.000000e+00> : vector<16x8xf32>
    %146 = tpu.matmul %141, %143, %cst_65 {dimension_numbers = #tpu.dot_dimension_numbers<[1], [1], [0], [0], [0, 0, 1, 0], [], []>} : vector<16x16xbf16>, vector<8x16xbf16>, vector<16x8xf32> -> vector<16x8xf32>
    %cst_66 = arith.constant dense<0xFF800000> : vector<16xf32>
    %147 = vector.multi_reduction <maximumf>, %146, %cst_66 [1] : vector<16x8xf32> to vector<16xf32>
    %148 = vector.shape_cast %147 : vector<16xf32> to vector<16x1xf32>
    %149 = vector.broadcast %148 : vector<16x1xf32> to vector<16x8xf32>
    %150 = arith.subf %146, %149 : vector<16x8xf32>
    %151 = math.exp %150 : vector<16x8xf32>
    %cst_67 = arith.constant dense<0.000000e+00> : vector<16xf32>
    %152 = vector.multi_reduction <add>, %151, %cst_67 [1] : vector<16x8xf32> to vector<16xf32>
    %153 = vector.shape_cast %152 : vector<16xf32> to vector<16x1xf32>
    %154 = vector.broadcast %153 : vector<16x1xf32> to vector<16x8xf32>
    %155 = arith.divf %151, %154 : vector<16x8xf32>
    %156 = arith.truncf %155 : vector<16x8xf32> to vector<16x8xbf16>
    %cst_68 = arith.constant dense<0.000000e+00> : vector<16x16xf32>
    %157 = tpu.matmul %156, %145, %cst_68 {dimension_numbers = #tpu.dot_dimension_numbers<[1], [0], [0], [1], [0, 0, 1, 1], [], []>} : vector<16x8xbf16>, vector<8x16xbf16>, vector<16x16xf32> -> vector<16x16xf32>
    %c0_69 = arith.constant 0 : index
    %c0_70 = arith.constant 0 : index
    %158 = vector.load %arg16[%c0_69, %c0_70] : memref<16x32xf32, #tpu.memory_space<vmem>>, vector<16x16xf32>
    tpu.vector_store %arg16[%c0_69, %c0_70], %157 {strides = array<i32>} : memref<16x32xf32, #tpu.memory_space<vmem>>, vector<16x16xf32>,
    %159 = vector.extract_strided_slice %134 {offsets = [0, 16], sizes = [16, 16], strides = [1, 1]} : vector<16x32xf32> to vector<16x16xf32>
    %160 = arith.truncf %159 : vector<16x16xf32> to vector<16x16xbf16>
    %161 = vector.extract_strided_slice %138 {offsets = [0, 16], sizes = [8, 16], strides = [1, 1]} : vector<8x32xf32> to vector<8x16xf32>
    %162 = arith.truncf %161 : vector<8x16xf32> to vector<8x16xbf16>
    %163 = vector.extract_strided_slice %139 {offsets = [0, 16], sizes = [8, 16], strides = [1, 1]} : vector<8x32xf32> to vector<8x16xf32>
    %164 = arith.truncf %163 : vector<8x16xf32> to vector<8x16xbf16>
    %cst_71 = arith.constant dense<0.000000e+00> : vector<16x8xf32>
    %165 = tpu.matmul %160, %162, %cst_71 {dimension_numbers = #tpu.dot_dimension_numbers<[1], [1], [0], [0], [0, 0, 1, 0], [], []>} : vector<16x16xbf16>, vector<8x16xbf16>, vector<16x8xf32> -> vector<16x8xf32>
    %cst_72 = arith.constant dense<0xFF800000> : vector<16xf32>
    %166 = vector.multi_reduction <maximumf>, %165, %cst_72 [1] : vector<16x8xf32> to vector<16xf32>
    %167 = vector.shape_cast %166 : vector<16xf32> to vector<16x1xf32>
    %168 = vector.broadcast %167 : vector<16x1xf32> to vector<16x8xf32>
    %169 = arith.subf %165, %168 : vector<16x8xf32>
    %170 = math.exp %169 : vector<16x8xf32>
    %cst_73 = arith.constant dense<0.000000e+00> : vector<16xf32>
    %171 = vector.multi_reduction <add>, %170, %cst_73 [1] : vector<16x8xf32> to vector<16xf32>
    %172 = vector.shape_cast %171 : vector<16xf32> to vector<16x1xf32>
    %173 = vector.broadcast %172 : vector<16x1xf32> to vector<16x8xf32>
    %174 = arith.divf %170, %173 : vector<16x8xf32>
    %175 = arith.truncf %174 : vector<16x8xf32> to vector<16x8xbf16>
    %cst_74 = arith.constant dense<0.000000e+00> : vector<16x16xf32>
    %176 = tpu.matmul %175, %164, %cst_74 {dimension_numbers = #tpu.dot_dimension_numbers<[1], [0], [0], [1], [0, 0, 1, 1], [], []>} : vector<16x8xbf16>, vector<8x16xbf16>, vector<16x16xf32> -> vector<16x16xf32>
    %c0_75 = arith.constant 0 : index
    %c16_76 = arith.constant 16 : index
    %177 = vector.load %arg16[%c0_75, %c16_76] : memref<16x32xf32, #tpu.memory_space<vmem>>, vector<16x16xf32>
    tpu.vector_store %arg16[%c0_75, %c16_76], %176 {strides = array<i32>} : memref<16x32xf32, #tpu.memory_space<vmem>>, vector<16x16xf32>,
    %c0_77 = arith.constant 0 : index
    %c0_78 = arith.constant 0 : index
    %178 = vector.load %arg16[%c0_77, %c0_78] : memref<16x32xf32, #tpu.memory_space<vmem>>, vector<16x32xf32>
    %c1_79 = arith.constant 1 : index
    %c0_80 = arith.constant 0 : index
    %c0_81 = arith.constant 0 : index
    %179 = vector.load %arg9[%c1_79, %c0_80, %c0_81] : memref<2x32x32xbf16, #tpu.memory_space<vmem>>, vector<1x32x32xbf16>
    %180 = vector.shape_cast %179 : vector<1x32x32xbf16> to vector<32x32xbf16>
    %c1_82 = arith.constant 1 : index
    %c0_83 = arith.constant 0 : index
    %181 = vector.load %arg10[%c1_82, %c0_83] : memref<2x32xf32, #tpu.memory_space<vmem>>, vector<1x32xf32>
    %182 = vector.shape_cast %181 : vector<1x32xf32> to vector<32xf32>
    %183 = arith.truncf %178 : vector<16x32xf32> to vector<16x32xbf16>
    %cst_84 = arith.constant dense<0.000000e+00> : vector<16x32xf32>
    %184 = tpu.matmul %183, %180, %cst_84 {dimension_numbers = #tpu.dot_dimension_numbers<[1], [0], [0], [1], [0, 0, 1, 1], [], []>} : vector<16x32xbf16>, vector<32x32xbf16>, vector<16x32xf32> -> vector<16x32xf32>
    %185 = arith.truncf %184 : vector<16x32xf32> to vector<16x32xbf16>
    %cst_85 = arith.constant dense<0.000000e+00> : vector<16x32xf32>
    %186 = tpu.matmul %0, %185, %cst_85 {dimension_numbers = #tpu.dot_dimension_numbers<[1], [0], [0], [1], [0, 0, 1, 1], [], []>} : vector<16x16xbf16>, vector<16x32xbf16>, vector<16x32xf32> -> vector<16x32xf32>
    %187 = vector.shape_cast %182 : vector<32xf32> to vector<1x32xf32>
    %188 = vector.broadcast %187 : vector<1x32xf32> to vector<16x32xf32>
    %189 = arith.addf %186, %188 : vector<16x32xf32>
    %190 = arith.addf %97, %189 : vector<16x32xf32>
    %c2 = arith.constant 2 : index
    %c0_86 = arith.constant 0 : index
    %191 = vector.load %arg4[%c2, %c0_86] : memref<3x32xf32, #tpu.memory_space<vmem>>, vector<1x32xf32>
    %192 = vector.shape_cast %191 : vector<1x32xf32> to vector<32xf32>
    %c2_87 = arith.constant 2 : index
    %c0_88 = arith.constant 0 : index
    %193 = vector.load %arg5[%c2_87, %c0_88] : memref<3x32xf32, #tpu.memory_space<vmem>>, vector<1x32xf32>
    %194 = vector.shape_cast %193 : vector<1x32xf32> to vector<32xf32>
    %c0_89 = arith.constant 0 : index
    %c0_90 = arith.constant 0 : index
    %195 = vector.load %arg11[%c0_89, %c0_90] : memref<32x256xbf16, #tpu.memory_space<vmem>>, vector<32x256xbf16>
    %c0_91 = arith.constant 0 : index
    %c0_92 = arith.constant 0 : index
    %196 = vector.load %arg12[%c0_91, %c0_92] : memref<1x256xf32, #tpu.memory_space<vmem>>, vector<1x256xf32>
    %c0_93 = arith.constant 0 : index
    %c0_94 = arith.constant 0 : index
    %197 = vector.load %arg13[%c0_93, %c0_94] : memref<128x32xbf16, #tpu.memory_space<vmem>>, vector<128x32xbf16>
    %c0_95 = arith.constant 0 : index
    %c0_96 = arith.constant 0 : index
    %198 = vector.load %arg14[%c0_95, %c0_96] : memref<1x32xf32, #tpu.memory_space<vmem>>, vector<1x32xf32>
    %cst_97 = arith.constant dense<0.000000e+00> : vector<16xf32>
    %199 = vector.multi_reduction <add>, %190, %cst_97 [1] : vector<16x32xf32> to vector<16xf32>
    %200 = vector.shape_cast %199 : vector<16xf32> to vector<16x1xf32>
    %cst_98 = arith.constant 3.200000e+01 : f32
    %201 = vector.broadcast %cst_98 : f32 to vector<16x1xf32>
    %202 = arith.divf %200, %201 : vector<16x1xf32>
    %203 = vector.broadcast %202 : vector<16x1xf32> to vector<16x32xf32>
    %204 = arith.subf %190, %203 : vector<16x32xf32>
    %205 = arith.mulf %204, %204 : vector<16x32xf32>
    %cst_99 = arith.constant dense<0.000000e+00> : vector<16xf32>
    %206 = vector.multi_reduction <add>, %205, %cst_99 [1] : vector<16x32xf32> to vector<16xf32>
    %207 = vector.shape_cast %206 : vector<16xf32> to vector<16x1xf32>
    %cst_100 = arith.constant 3.200000e+01 : f32
    %208 = vector.broadcast %cst_100 : f32 to vector<16x1xf32>
    %209 = arith.divf %207, %208 : vector<16x1xf32>
    %cst_101 = arith.constant 9.99999974E-6 : f32
    %210 = vector.broadcast %cst_101 : f32 to vector<16x1xf32>
    %211 = arith.addf %209, %210 : vector<16x1xf32>
    %212 = math.rsqrt %211 : vector<16x1xf32>
    %213 = vector.broadcast %212 : vector<16x1xf32> to vector<16x32xf32>
    %214 = arith.mulf %204, %213 : vector<16x32xf32>
    %215 = vector.shape_cast %192 : vector<32xf32> to vector<1x32xf32>
    %216 = vector.broadcast %215 : vector<1x32xf32> to vector<16x32xf32>
    %217 = arith.mulf %214, %216 : vector<16x32xf32>
    %218 = vector.shape_cast %194 : vector<32xf32> to vector<1x32xf32>
    %219 = vector.broadcast %218 : vector<1x32xf32> to vector<16x32xf32>
    %220 = arith.addf %217, %219 : vector<16x32xf32>
    %221 = arith.truncf %220 : vector<16x32xf32> to vector<16x32xbf16>
    %cst_102 = arith.constant dense<0.000000e+00> : vector<16x32xf32>
    %222 = tpu.matmul %0, %221, %cst_102 {dimension_numbers = #tpu.dot_dimension_numbers<[1], [0], [0], [1], [0, 0, 1, 1], [], []>} : vector<16x16xbf16>, vector<16x32xbf16>, vector<16x32xf32> -> vector<16x32xf32>
    %223 = arith.truncf %222 : vector<16x32xf32> to vector<16x32xbf16>
    %cst_103 = arith.constant dense<0.000000e+00> : vector<16x256xf32>
    %224 = tpu.matmul %223, %195, %cst_103 {dimension_numbers = #tpu.dot_dimension_numbers<[1], [0], [0], [1], [0, 0, 1, 1], [], []>} : vector<16x32xbf16>, vector<32x256xbf16>, vector<16x256xf32> -> vector<16x256xf32>
    %225 = vector.broadcast %196 : vector<1x256xf32> to vector<16x256xf32>
    %226 = arith.addf %224, %225 : vector<16x256xf32>
    %227 = vector.extract_strided_slice %226 {offsets = [0, 0], sizes = [16, 128], strides = [1, 1]} : vector<16x256xf32> to vector<16x128xf32>
    %228 = vector.extract_strided_slice %226 {offsets = [0, 128], sizes = [16, 128], strides = [1, 1]} : vector<16x256xf32> to vector<16x128xf32>
    %cst_104 = arith.constant 5.000000e-01 : f32
    %229 = vector.broadcast %cst_104 : f32 to vector<16x128xf32>
    %230 = arith.mulf %229, %228 : vector<16x128xf32>
    %cst_105 = arith.constant 0.707106769 : f32
    %231 = vector.broadcast %cst_105 : f32 to vector<16x128xf32>
    %232 = arith.mulf %228, %231 : vector<16x128xf32>
    %233 = math.erf %232 : vector<16x128xf32>
    %cst_106 = arith.constant 1.000000e+00 : f32
    %234 = vector.broadcast %cst_106 : f32 to vector<16x128xf32>
    %235 = arith.addf %234, %233 : vector<16x128xf32>
    %236 = arith.mulf %230, %235 : vector<16x128xf32>
    %237 = arith.mulf %227, %236 : vector<16x128xf32>
    %238 = arith.truncf %237 : vector<16x128xf32> to vector<16x128xbf16>
    %cst_107 = arith.constant dense<0.000000e+00> : vector<16x32xf32>
    %239 = tpu.matmul %238, %197, %cst_107 {dimension_numbers = #tpu.dot_dimension_numbers<[1], [0], [0], [1], [0, 0, 1, 1], [], []>} : vector<16x128xbf16>, vector<128x32xbf16>, vector<16x32xf32> -> vector<16x32xf32>
    %240 = arith.truncf %239 : vector<16x32xf32> to vector<16x32xbf16>
    %cst_108 = arith.constant dense<0.000000e+00> : vector<16x32xf32>
    %241 = tpu.matmul %0, %240, %cst_108 {dimension_numbers = #tpu.dot_dimension_numbers<[1], [0], [0], [1], [0, 0, 1, 1], [], []>} : vector<16x16xbf16>, vector<16x32xbf16>, vector<16x32xf32> -> vector<16x32xf32>
    %242 = vector.broadcast %198 : vector<1x32xf32> to vector<16x32xf32>
    %243 = arith.addf %241, %242 : vector<16x32xf32>
    %244 = arith.addf %190, %243 : vector<16x32xf32>
    %c0_109 = arith.constant 0 : index
    %c0_110 = arith.constant 0 : index
    %c0_111 = arith.constant 0 : index
    %245 = vector.load %arg15[%c0_109, %c0_110, %c0_111] : memref<1x16x32xf32, #tpu.memory_space<vmem>>, vector<1x16x32xf32>
    %246 = vector.shape_cast %245 : vector<1x16x32xf32> to vector<16x32xf32>
    %247 = vector.shape_cast %244 : vector<16x32xf32> to vector<1x16x32xf32>
    tpu.vector_store %arg15[%c0_109, %c0_110, %c0_111], %247 {strides = array<i32>} : memref<1x16x32xf32, #tpu.memory_space<vmem>>, vector<1x16x32xf32>,
    return
  }
  func.func @transform_0(%arg0: i32) -> (i32, i32, i32) {
    %c0_i32 = arith.constant 0 : i32
    %c0_i32_0 = arith.constant 0 : i32
    %c0_i32_1 = arith.constant 0 : i32
    return %arg0, %c0_i32, %c0_i32_0 : i32, i32, i32
  }
  func.func @transform_1(%arg0: i32) -> (i32, i32, i32) {
    %c0_i32 = arith.constant 0 : i32
    %c0_i32_0 = arith.constant 0 : i32
    %c0_i32_1 = arith.constant 0 : i32
    return %arg0, %c0_i32, %c0_i32_0 : i32, i32, i32
  }
  func.func @transform_2(%arg0: i32) -> (i32, i32) {
    %c0_i32 = arith.constant 0 : i32
    %c0_i32_0 = arith.constant 0 : i32
    %c0_i32_1 = arith.constant 0 : i32
    return %c0_i32, %c0_i32_0 : i32, i32
  }
  func.func @transform_3(%arg0: i32) -> (i32, i32) {
    %c0_i32 = arith.constant 0 : i32
    %c0_i32_0 = arith.constant 0 : i32
    %c0_i32_1 = arith.constant 0 : i32
    return %c0_i32, %c0_i32_0 : i32, i32
  }
  func.func @transform_4(%arg0: i32) -> (i32, i32) {
    %c0_i32 = arith.constant 0 : i32
    %c0_i32_0 = arith.constant 0 : i32
    %c0_i32_1 = arith.constant 0 : i32
    return %c0_i32, %c0_i32_0 : i32, i32
  }
  func.func @transform_5(%arg0: i32) -> (i32, i32, i32) {
    %c0_i32 = arith.constant 0 : i32
    %c0_i32_0 = arith.constant 0 : i32
    %c0_i32_1 = arith.constant 0 : i32
    %c0_i32_2 = arith.constant 0 : i32
    return %c0_i32, %c0_i32_0, %c0_i32_1 : i32, i32, i32
  }
  func.func @transform_6(%arg0: i32) -> (i32, i32) {
    %c0_i32 = arith.constant 0 : i32
    %c0_i32_0 = arith.constant 0 : i32
    %c0_i32_1 = arith.constant 0 : i32
    return %c0_i32, %c0_i32_0 : i32, i32
  }
  func.func @transform_7(%arg0: i32) -> (i32, i32, i32) {
    %c0_i32 = arith.constant 0 : i32
    %c0_i32_0 = arith.constant 0 : i32
    %c0_i32_1 = arith.constant 0 : i32
    %c0_i32_2 = arith.constant 0 : i32
    return %c0_i32, %c0_i32_0, %c0_i32_1 : i32, i32, i32
  }
  func.func @transform_8(%arg0: i32) -> (i32, i32, i32) {
    %c0_i32 = arith.constant 0 : i32
    %c0_i32_0 = arith.constant 0 : i32
    %c0_i32_1 = arith.constant 0 : i32
    %c0_i32_2 = arith.constant 0 : i32
    return %c0_i32, %c0_i32_0, %c0_i32_1 : i32, i32, i32
  }
  func.func @transform_9(%arg0: i32) -> (i32, i32) {
    %c0_i32 = arith.constant 0 : i32
    %c0_i32_0 = arith.constant 0 : i32
    %c0_i32_1 = arith.constant 0 : i32
    return %c0_i32, %c0_i32_0 : i32, i32
  }
  func.func @transform_10(%arg0: i32) -> (i32, i32) {
    %c0_i32 = arith.constant 0 : i32
    %c0_i32_0 = arith.constant 0 : i32
    %c0_i32_1 = arith.constant 0 : i32
    return %c0_i32, %c0_i32_0 : i32, i32
  }
  func.func @transform_11(%arg0: i32) -> (i32, i32) {
    %c0_i32 = arith.constant 0 : i32
    %c0_i32_0 = arith.constant 0 : i32
    %c0_i32_1 = arith.constant 0 : i32
    return %c0_i32, %c0_i32_0 : i32, i32
  }
  func.func @transform_12(%arg0: i32) -> (i32, i32) {
    %c0_i32 = arith.constant 0 : i32
    %c0_i32_0 = arith.constant 0 : i32
    %c0_i32_1 = arith.constant 0 : i32
    return %c0_i32, %c0_i32_0 : i32, i32
  }
  func.func @transform_13(%arg0: i32) -> (i32, i32) {
    %c0_i32 = arith.constant 0 : i32
    %c0_i32_0 = arith.constant 0 : i32
    %c0_i32_1 = arith.constant 0 : i32
    return %c0_i32, %c0_i32_0 : i32, i32
  }
  func.func @transform_14(%arg0: i32) -> (i32, i32, i32) {
    %c0_i32 = arith.constant 0 : i32
    %c0_i32_0 = arith.constant 0 : i32
    %c0_i32_1 = arith.constant 0 : i32
    return %arg0, %c0_i32, %c0_i32_0 : i32, i32, i32
  }
}

</mosaic_0001>

<bundles_post_ra>
// kernel: graph_transformer_block.1
= control target key start
LH: loop header
LB: loop body
LE: loop exit
PB: predicated region body
PF: predicated region fallthrough
CT: control target
= control target key end

     0   :  { %s3562_s0 = inlined_call_operand.vmem [shape: f32[2,16,32], index: 0, kind: input, shape index: {}]   ;;  %s3563_s1 = inlined_call_operand.vmem [shape: bf16[2,8,8], index: 1, kind: input, shape index: {}]   ;;  %s3564_s2 = inlined_call_operand.vmem [shape: bf16[16,16], index: 2, kind: input, shape index: {}]   ;;  %s3565_s3 = inlined_call_operand.hbm [shape: f32[3,32], index: 3, kind: input, shape index: {}]   ;;  %s3566_s4 = inlined_call_operand.hbm [shape: f32[3,32], index: 4, kind: input, shape index: {}]   ;;  %s3567_s5 = inlined_call_operand.vmem [shape: bf16[2,32,32], index: 5, kind: input, shape index: {}]   ;;  %s3568_s6 = inlined_call_operand.vmem [shape: f32[2,32], index: 6, kind: input, shape index: {}]   ;;  %s3569_s7 = inlined_call_operand.hbm [shape: bf16[2,8,64], index: 7, kind: input, shape index: {}]   ;;  %s3570_s8 = inlined_call_operand.vmem [shape: bf16[2,32,32], index: 8, kind: input, shape index: {}]   ;;  %s3571_s9 = inlined_call_operand.hbm [shape: f32[2,32], index: 9, kind: input, shape index: {}]   ;;  %s3572_s10 = inlined_call_operand.vmem [shape: bf16[32,256], index: 10, kind: input, shape index: {}]   ;;  %s3573_s11 = inlined_call_operand.hbm [shape: f32[1,256], index: 11, kind: input, shape index: {}]   ;;  %s3574_s12 = inlined_call_operand.vmem [shape: bf16[128,32], index: 12, kind: input, shape index: {}]   ;;  %s3575_s13 = inlined_call_operand.hbm [shape: f32[1,32], index: 13, kind: input, shape index: {}]   ;;  %s3576_s14 = inlined_call_operand.hbm [shape: f32[2,16,32], index: 14, kind: output, shape index: {}]  }
   0x1   :  { %3589 = sst [smem:[#allocation27_spill]] %s3565_s3 }
   0x2   :  { %3590 = sst [smem:[#allocation28_spill]] %s3566_s4 }
   0x3   :  { %3591 = sst [smem:[#allocation29_spill]] %s3576_s14 }
   0x4   :  { %19 = vsyncpa [#allocation4], 0 }
   0x5   :  { %20 = vsyncpa [#allocation7], 0 }
   0x6   :  { %21 = vsyncpa [#allocation10], 0 }
   0x7   :  { %22 = vsyncpa [#allocation13], 0 }
   0x8   :  { %23 = vsyncpa [#allocation5], 0 }
   0x9   :  { %25 = vsyncpa [#allocation5 + $0x1], 0  ;;  %s3007_s29 = smov 0   ;;  %s3009_s30 = smov 0  }
   0xa   :  { %s3011_s15 = smov 0   ;;  %s3013_s16 = smov 0  }
   0xb LB: > { %3592 = sst [smem:[#allocation20_spill]] %s2900_s29  ;;  %s3028_s17 = sadd.s32 4294967295, %s2912_s16   ;;  %s2912_s16 = sphi %s3013_s16, %s3622_s16   ;;  %s2908_s15 = sphi %s3011_s15, %s3624_s15   ;;  %s2904_s30 = sphi %s3009_s30, %s3626_s30   ;;  %s2900_s29 = sphi %s3007_s29, %s3625_s29  }
   0xc   : > { %3593 = sst [smem:[#allocation21_spill]] %s2908_s15  ;;  %s2195_s18 = sadd.s32 4294967294, %s2912_s16  }
   0xd   : > { %3594 = sst [smem:[#allocation22_spill]] %s2912_s16  ;;  %s3032_s19 = sadd.s32 1, %s2912_s16  }
   0xe   : > { %3595 = sst [smem:[#allocation23_spill]] %s3032_s19  ;;  %s342_s20 = sadd.s32 1, %s2908_s15 }
   0xf   : > { %s339_s21 = ssub.s32 %s2912_s16, %s3032_s19  ;;  %p352_p0 = scmp.ne.s32.totalorder %s2908_s15, %s2904_s30 }
  0x10   : > { %p340_p1 = scmp.eq.s32.totalorder %s339_s21, 0  ;;  %p353_p2 = scmp.eq.s32.totalorder %s3028_s17, 1 }
  0x11   : > { %p358_p3 = scmp.ne.s32.totalorder %s2904_s30, %s2900_s29  ;;  %p359_p4 = scmp.eq.s32.totalorder %s2195_s18, 1 }
  0x12   : > { %s3043_s22 = scalar_select %p340_p1, %s2908_s15, %s342_s20  }
  0x13   : > { %p3045_p5 = por %p353_p2, %p352_p0  ;;  %p3049_p6 = por %p359_p4, %p358_p3 }
  0x14   : > { %3596 = sst [smem:[#allocation24_spill]] %s3043_s22  ;;  %p2196_p7 = scmp.ge.s32.totalorder %s2912_s16, 1 }
  0x15   : > { %s3597_s23 = scalar_select %p3045_p5, 1, 0 }
  0x16   : > { %s3599_s24 = scalar_select %p3049_p6, 1, 0 }
  0x17   : > { %3598 = sst [smem:[#allocation25_spill]] %s3597_s23  ;;  %p366_p8 = scmp.lt.s32.totalorder %s2912_s16, 3 }
  0x18   : > { %3600 = sst [smem:[#allocation26_spill]] %s3599_s24  ;;  %p3583_p9 = scmp.eq.s32.totalorder %s3028_s17, 0 }
  0x19   : > { %p3056_p10 = pnand %p2196_p7, %p366_p8  ;;  %s2914_s26 = smov [#allocation6]  }
  0x1a   : > { %s393_s27 = sshll.u32 %s2914_s26, 4  ;;  %s2915_s28 = smov [#allocation9]   ;;  %s394_s27 = int_to_ptr.vmem [resolvable:$true] %s393_s27 }
  0x1b   : > { %s3601_s25 = scalar_select %p3056_p10, 1, 0 }
  0x1c   : > { %p2510_p11 = pneg %p3056_p10  ;;  %s426_s18 = sshll.u32 %s2915_s28, 4  ;;  %s3068_s18 = int_to_ptr.vmem [resolvable:$true] %s426_s18 }
  0x1d   : > { %s2916_s21 = smov [#allocation3]   ;;  %s3603_s4 = sld [smem:[#allocation28_spill]] }
  0x1e   : > { %p3064_p12 = pnand %p3583_p9, %p2510_p11  ;;  %s382_s22 = sshll.u32 %s2916_s21, 4  ;;  %s3070_s22 = int_to_ptr.vmem [resolvable:$true] %s382_s22 }
  0x20   : > { %p3080_p0 = pneg %p3064_p12 }
  0x23   : > { %s2666_s26 = scalar_lea.hbm %s3603_s4, 64 }
  0x24   : > { %p2667_p13 = scmp.ne.s32.totalorder %s3603_s4, %s2666_s26  ;;  %p2673_p3 = scmp.lt.u32.totalorder %s2666_s26, %s3603_s4 }
  0x26   : > { %p2669_p1 = pnand %p3080_p0, %p2667_p13 }
  0x28   : > { %p2670_p2 = pneg %p2669_p1 }
  0x2a   : > { %p2675_p4 = pnand %p2673_p3, %p2670_p2 }
  0x2c   : > { %2678 = shalt.err (!%p2675_p4)
}
  0x2d   : > { %s2679_s15 = scalar_lea.vmem %s394_s27, 64  ;;  %p2687_p9 = scmp.lt.s32.totalorder %s394_s27, %s394_s27 }
  0x2e   : > { %p2680_p7 = scmp.ne.s32.totalorder %s394_s27, %s2679_s15  ;;  %p2688_p6 = scmp.lt.s32.totalorder %s2679_s15, %s2679_s15 }
  0x30   : > { %p2682_p8 = pnand %p2680_p7, %p3080_p0  ;;  %p2689_p5 = por %p2688_p6, %p2687_p9 }
  0x32   : > { %p2683_p11 = pneg %p2682_p8 }
  0x34   : > { %p2690_p10 = pnand %p2689_p5, %p2683_p11 }
  0x36   : > { %2693 = shalt.err (!%p2690_p10)
}
  0x37   : > { %2516 = dma.hbm_to_vmem [thread:$0]  (!%p3064_p12), %s3603_s4, 64, %s394_s27, [#allocation7]  }
  0x38   : > { %s2694_s26 = scalar_lea.hbm %s3571_s9, 32 }
  0x39   : > { %p2695_p13 = scmp.ne.s32.totalorder %s3571_s9, %s2694_s26  ;;  %p2701_p5 = scmp.lt.u32.totalorder %s2694_s26, %s3571_s9 }
  0x3b   : > { %p2697_p1 = pnand %p2695_p13, %p3080_p0 }
  0x3d   : > { %p2698_p6 = pneg %p2697_p1 }
  0x3f   : > { %p2703_p9 = pnand %p2701_p5, %p2698_p6 }
  0x41   : > { %2706 = shalt.err (!%p2703_p9)
}
  0x42   : > { %s2707_s27 = scalar_lea.vmem %s3068_s18, 32  ;;  %p2715_p4 = scmp.lt.s32.totalorder %s3068_s18, %s3068_s18 }
  0x43   : > { %p2708_p10 = scmp.ne.s32.totalorder %s3068_s18, %s2707_s27  ;;  %p2716_p7 = scmp.lt.s32.totalorder %s2707_s27, %s2707_s27 }
  0x45   : > { %p2710_p2 = pnand %p2708_p10, %p3080_p0  ;;  %p2717_p8 = por %p2716_p7, %p2715_p4 }
  0x47   : > { %p2711_p3 = pneg %p2710_p2 }
  0x49   : > { %p2718_p11 = pnand %p2717_p8, %p2711_p3 }
  0x4b   : > { %2721 = shalt.err (!%p2718_p11)
}
  0x4c   : > { %2522 = dma.hbm_to_vmem [thread:$0]  (!%p3064_p12), %s3571_s9, 32, %s3068_s18, [#allocation10]  }
  0x4d   : > { %s3605_s3 = sld [smem:[#allocation27_spill]] }
  0x53   : > { %s2722_s16 = scalar_lea.hbm %s3605_s3, 64 }
  0x54   : > { %p2723_p13 = scmp.ne.s32.totalorder %s3605_s3, %s2722_s16  ;;  %p2729_p5 = scmp.lt.u32.totalorder %s2722_s16, %s3605_s3 }
  0x56   : > { %p2725_p1 = pnand %p2723_p13, %p3080_p0 }
  0x58   : > { %p2726_p6 = pneg %p2725_p1 }
  0x5a   : > { %p2731_p9 = pnand %p2729_p5, %p2726_p6 }
  0x5c   : > { %2734 = shalt.err (!%p2731_p9)
}
  0x5d   : > { %s2735_s18 = scalar_lea.vmem %s3070_s22, 64  ;;  %p2743_p4 = scmp.lt.s32.totalorder %s3070_s22, %s3070_s22 }
  0x5e   : > { %p2736_p10 = scmp.ne.s32.totalorder %s3070_s22, %s2735_s18  ;;  %p2744_p7 = scmp.lt.s32.totalorder %s2735_s18, %s2735_s18 }
  0x60   : > { %p2738_p2 = pnand %p2736_p10, %p3080_p0  ;;  %p2745_p8 = por %p2744_p7, %p2743_p4 }
  0x62   : > { %p2739_p3 = pneg %p2738_p2 }
  0x64   : > { %p2746_p11 = pnand %p2745_p8, %p2739_p3 }
  0x66   : > { %2749 = shalt.err (!%p2746_p11)
}
  0x67   : > { %2513 = dma.hbm_to_vmem [thread:$0]  (!%p3064_p12), %s3605_s3, 64, %s3070_s22, [#allocation4]  }
  0x68   : > { %s2917_s23 = smov [#allocation8]   ;;  %s2750_s24 = scalar_lea.hbm %s3569_s7, 128 }
  0x69   : > { %s409_s29 = sshll.u32 %s2917_s23, 4  ;;  %p2751_p13 = scmp.ne.s32.totalorder %s3569_s7, %s2750_s24  ;;  %s410_s29 = int_to_ptr.vmem [resolvable:$true] %s409_s29 }
  0x6a   : > { %p2757_p5 = scmp.lt.u32.totalorder %s2750_s24, %s3569_s7 }
  0x6b   : > { %p2753_p1 = pnand %p2751_p13, %p3080_p0 }
  0x6d   : > { %p2754_p6 = pneg %p2753_p1 }
  0x6f   : > { %p2759_p9 = pnand %p2757_p5, %p2754_p6 }
  0x71   : > { %2762 = shalt.err (!%p2759_p9)
}
  0x72   : > { %s2763_s22 = scalar_lea.vmem %s410_s29, 128  ;;  %p2771_p4 = scmp.lt.s32.totalorder %s410_s29, %s410_s29 }
  0x73   : > { %p2764_p10 = scmp.ne.s32.totalorder %s410_s29, %s2763_s22  ;;  %p2772_p7 = scmp.lt.s32.totalorder %s2763_s22, %s2763_s22 }
  0x75   : > { %p2766_p2 = pnand %p2764_p10, %p3080_p0  ;;  %p2773_p8 = por %p2772_p7, %p2771_p4 }
  0x77   : > { %p2767_p3 = pneg %p2766_p2 }
  0x79   : > { %p2774_p11 = pnand %p2773_p8, %p2767_p3 }
  0x7b   : > { %2777 = shalt.err (!%p2774_p11)
}
  0x7c   : > { %s2918_s27 = smov 64   ;;  %s2919_s14 = smov 4  }
  0x7d   : > { %2519 = dma.hbm_to_vmem [thread:$0]  (!%p3064_p12), %s3569_s7, 128, %s410_s29, [#allocation7], %s2918_s27, %s2918_s27, %s2919_s14  }
  0x7e   : > { %s2920_s16 = smov [#allocation11]   ;;  %s2921_s26 = smov [#allocation12]  }
  0x7f   : > { %s440_s24 = sshll.u32 %s2920_s16, 4  ;;  %s454_s21 = sshll.u32 %s2921_s26, 4  ;;  %s441_s24 = int_to_ptr.vmem [resolvable:$true] %s440_s24  ;;  %s3160_s21 = int_to_ptr.vmem [resolvable:$true] %s454_s21 }
  0x80   : > { %s2778_s22 = scalar_lea.hbm %s3573_s11, 32 }
  0x81   : > { %p2779_p13 = scmp.ne.s32.totalorder %s3573_s11, %s2778_s22  ;;  %p2785_p5 = scmp.lt.u32.totalorder %s2778_s22, %s3573_s11 }
  0x83   : > { %p2781_p1 = pnand %p2779_p13, %p3080_p0 }
  0x85   : > { %p2782_p6 = pneg %p2781_p1 }
  0x87   : > { %p2787_p9 = pnand %p2785_p5, %p2782_p6 }
  0x89   : > { %2790 = shalt.err (!%p2787_p9)
}
  0x8a   : > { %s2791_s27 = scalar_lea.vmem %s441_s24, 32  ;;  %p2799_p4 = scmp.lt.s32.totalorder %s441_s24, %s441_s24 }
  0x8b   : > { %p2792_p10 = scmp.ne.s32.totalorder %s441_s24, %s2791_s27  ;;  %p2800_p7 = scmp.lt.s32.totalorder %s2791_s27, %s2791_s27 }
  0x8d   : > { %p2794_p2 = pnand %p2792_p10, %p3080_p0  ;;  %p2801_p8 = por %p2800_p7, %p2799_p4 }
  0x8f   : > { %p2795_p3 = pneg %p2794_p2 }
  0x91   : > { %p2802_p11 = pnand %p2801_p8, %p2795_p3 }
  0x93   : > { %2805 = shalt.err (!%p2802_p11)
}
  0x94   : > { %2525 = dma.hbm_to_vmem [thread:$0]  (!%p3064_p12), %s3573_s11, 32, %s441_s24, [#allocation10]  }
  0x95   : > { %s2806_s16 = scalar_lea.hbm %s3575_s13, 16 }
  0x96   : > { %p2807_p13 = scmp.ne.s32.totalorder %s3575_s13, %s2806_s16  ;;  %p2813_p5 = scmp.lt.u32.totalorder %s2806_s16, %s3575_s13 }
  0x98   : > { %p2809_p1 = pnand %p2807_p13, %p3080_p0 }
  0x9a   : > { %p2810_p6 = pneg %p2809_p1 }
  0x9c   : > { %p2815_p9 = pnand %p2813_p5, %p2810_p6 }
  0x9e   : > { %2818 = shalt.err (!%p2815_p9)
}
  0x9f   : > { %s2819_s24 = scalar_lea.vmem %s3160_s21, 16  ;;  %s2826_s23 = scalar_lea.vmem %s3160_s21, 32 }
  0xa0   : > { %p2820_p10 = scmp.ne.s32.totalorder %s3160_s21, %s2819_s24  ;;  %p2827_p4 = scmp.lt.s32.totalorder %s3160_s21, %s3160_s21 }
  0xa1   : > { %p2828_p7 = scmp.lt.s32.totalorder %s2826_s23, %s2819_s24 }
  0xa2   : > { %p2822_p2 = pnand %p2820_p10, %p3080_p0 }
  0xa3   : > { %p2829_p8 = por %p2828_p7, %p2827_p4 }
  0xa4   : > { %p2823_p3 = pneg %p2822_p2 }
  0xa6   : > { %p2830_p11 = pnand %p2829_p8, %p2823_p3 }
  0xa8   : > { %2833 = shalt.err (!%p2830_p11)
}
  0xa9   : > { %2528 = dma.hbm_to_vmem [thread:$0]  (!%p3064_p12), %s3575_s13, 16, %s3160_s21, [#allocation13]  }
  0xaa   : > { %p3606_p13 = scmp.ne.s32.totalorder %s3601_s25, 0 }
  0xab   : > { %p3607_p0 = scmp.eq.s32.totalorder (!%p3606_p13), %s3028_s17, 0 }
  0xac   : > { %482 = sbr.rel (%p3606_p13) target bundleno = 5778 (0x1692), region = 76 }
  0xb3   : > { %2879 = dma.done.wait (%p3607_p0), [#allocation4], 64   ;;  %p3608_p1 = pmov %p3607_p0 }
  0xb4   : > { %p3609_p6 = pmov %p3607_p0 }
  0xb5   : > { %2881 = vsyncadd (%p3608_p1), [#allocation4], 4294967232 }
  0xb6   : > { %2883 = dma.done.wait (%p3609_p6), [#allocation7], 192   ;;  %p3610_p5 = pmov %p3607_p0 }
  0xb7   : > { %p3611_p9 = pmov %p3607_p0 }
  0xb8   : > { %2885 = vsyncadd (%p3610_p5), [#allocation7], 4294967104 }
  0xb9   : > { %2887 = dma.done.wait (%p3611_p9), [#allocation10], 64   ;;  %p3612_p12 = pmov %p3607_p0 }
  0xba   : > { %p3613_p10 = pmov %p3607_p0 }
  0xbb   : > { %2889 = vsyncadd (%p3612_p12), [#allocation10], 4294967232 }
  0xbc   : > { %2891 = dma.done.wait (%p3613_p10), [#allocation13], 16   ;;  %p3614_p2 = pmov %p3607_p0 }
  0xbd   : > { %p552_p3 = scmp.lt.s32.totalorder %s3028_s17, 1  ;;  %vm569_vm0 = vcmask 261120   ;;  %v2922_v14 = vmov 0.0   ;;  %vm2923_vm1 = vmmov 0   ;;  %v726_v15 = vld [vmem:[#allocation8] sm:$0xf] }
  0xbe   : > { %2893 = vsyncadd (%p3614_p2), [#allocation13], 4294967280  ;;  %2336 = vmatprep.subr.bf16.mxu1 %v2922_v14  ;;  %2350 = vmatprep.subr.bf16.mxu0 %v2922_v14  ;;  %vm731_vm2 = vcmask 1043456   ;;  %vm727_vm3 = vcmask 64512   ;;  %v2215_v26 = vld [vmem:[#allocation3] ss:$0 sm:$0xff] }
  0xbf   : > { %s3224_s25 = scalar_select %p552_p3, %s3028_s17, 1  ;;  %2338 = vmatprep.mubr.msk.bf16.mxu1 %vm2923_vm1, %v2922_v14  ;;  %2352 = vmatprep.mubr.msk.bf16.mxu0 %vm2923_vm1, %v2922_v14  ;;  %v733_v16 = vsel %vm731_vm2, %v726_v15, 0  ;;  %v2216_v30 = vld [vmem:[#allocation6] ss:$0 sm:$0xff]  ;;  %v3263_v35 = vld [vmem:[%s3564_s2] sm:$0xff]   ;;  %vm615_vm4 = vcmask 130048  }
  0xc0   : > { %2351 = vmatpush3.bf16.msra.mxu0 %v733_v16  ;;  %v2596_v36 = vld [vmem:[%s3567_s5] sm:$0xff]   ;;  %v2597_v37 = vld [vmem:[%s3567_s5 + $0x8] sm:$0xff]   ;;  %s2924_s29 = smov 112   ;;  %s2926_s28 = smov 96   ;;  %vm1031_vm5 = vcmask 261248  }
  0xc1   : > { %s2281_s20 = sshll.u32 %s3224_s25, 4  ;;  %s2214_s4 = sshll.u32 %s3224_s25, 2  ;;  %2362 = vmatprep.subr.bf16.mxu0 %v2922_v14  ;;  %v2219_v49 = vld [vmem:[%s3568_s6] ss:$0 sm:$0xff] }
  0xc2   : > { %s556_s3 = scalar_lea.vmem %s3562_s0, %s2281_s20  ;;  %s560_s16 = scalar_lea.vmem %s3563_s1, %s2214_s4 }
  0xc3   : > { %v3230_v0 = vld [vmem:[%s556_s3] sm:$0xff]  ;;  %v3232_v1 = vld [vmem:[%s556_s3 + $0x8] sm:$0xff]  ;;  %s2925_s20 = smov 80   ;;  %s2927_s19 = smov 16  }
  0xc4   : > { %v570_v2 = vsel %vm569_vm0, %v3230_v0, 0.0  ;;  %v573_v3 = vsel %vm569_vm0, %v3232_v1, 0.0  ;;  %v3253_v17 = vld [vmem:[%s560_s16] sm:$0xf]  ;;  %s549_s16 = sand.u32 1, %s2904_s30   ;;  %s3615_s15 = sld [smem:[#allocation25_spill]] }
  0xc5   : > { %571 = vadd.xlane.f32.xlu0 %v570_v2  ;;  %2353 = vmatmul.mubr.msk.bf16.vlgmr.msra.gmra.mrb[0].mxu0 %vm727_vm3, %v3253_v17  ;;  %s2211_s26 = sshll.u32 %s549_s16, 4  ;;  %s2282_s18 = sshll.u32 %s3028_s17, 8 }
  0xc6   : > { %2364 = vmatprep.mubr.msk.bf16.mxu0 %vm2923_vm1, %v2922_v14  ;;  %s551_s22 = scalar_lea.vmem [#allocation14], %s2211_s26  ;;  %s3616_s27 = sld [smem:[#allocation29_spill]] }
  0xc7   : > { %s2061_s24 = sshll.u32 %s551_s22, 4  ;;  %s3521_s17 = scalar_lea.sflag [#allocation5], %s549_s16  ;;  %s3516_s24 = int_to_ptr.vmem [resolvable:$true] %s2061_s24 }
  0xc9   : > { %574 = vadd.xlane.f32.xlu0 %v573_v3 }
  0xca   : > { %p3617_p7 = scmp.ne.s32.totalorder %s3615_s15, 0 }
  0xcc   : > { %s3514_s25 = scalar_lea.hbm %s3616_s27, %s2282_s18 }
 0x152   : > { %v572_v4 = vpop.xlane.xlu0 %571 }
 0x153   : > { %v577_v5 = vmul.f32 0.03125, %v572_v4 }
 0x155   : > { %v579_v6 = vsub.f32 %v3230_v0, %v577_v5 }
 0x156   : > { %v575_v7 = vpop.xlane.xlu0 %574 }
 0x157   : > { %v578_v8 = vmul.f32 0.03125, %v575_v7  ;;  %v581_v9 = vmul.f32 %v579_v6, %v579_v6 }
 0x159   : > { %v580_v10 = vsub.f32 %v3232_v1, %v578_v8  ;;  %v583_v11 = vsel %vm569_vm0, %v581_v9, 0.0 }
 0x15a   : > { %584 = vadd.xlane.f32.xlu1 %v583_v11 }
 0x15b   : > { %v582_v12 = vmul.f32 %v580_v10, %v580_v10 }
 0x15d   : > { %v586_v13 = vsel %vm569_vm0, %v582_v12, 0.0 }
 0x15e   : > { %587 = vadd.xlane.f32.xlu1 %v586_v13 }
 0x198   : > { %v769_v38 = vpop.f32.mrb[0].mxu0 }
 0x199   : > { %v3278_v39 = vpack.c.bf16 %v769_v38, %v769_v38  ;;  %v2354_v40 = vpop.f32.mrb[1].mxu0 }
 0x19a   : > { %v772_v41 = vpop.f32.mrb[2].mxu0 }
 0x19b   : > { %v2355_v42 = vpop.f32.mrb[3].mxu0  ;;  %902 = vrot.lane.b32.xlu0 %v3278_v39, %s2924_s29  ;;  %v781_v48 = vsel %vm615_vm4, %v3278_v39, 0 }
 0x1e7   : > { %v585_v18 = vpop.xlane.xlu1 %584 }
 0x1e8   : > { %v589_v19 = vmul.f32 0.03125, %v585_v18 }
 0x1ea   : > { %v591_v20 = vadd.f32 1e-05, %v589_v19 }
 0x1eb   : > { %v588_v21 = vpop.xlane.xlu1 %587 }
 0x1ec   : > { %2618 = vrsqrt.f32 %v591_v20  ;;  %v590_v22 = vmul.f32 0.03125, %v588_v21 }
 0x1ee   : > { %v592_v23 = vadd.f32 1e-05, %v590_v22 }
 0x1f0   : > { %2620 = vrsqrt.f32 %v592_v23 }
 0x1f6   : > { %v2619_v24 = vpop.eup %2618 }
 0x1f7   : > { %v595_v25 = vmul.f32 %v2619_v24, %v579_v6 }
 0x1f9   : > { %v601_v29 = vmul.f32 %v2215_v26, %v595_v25 }
 0x1fa   : > { %v2621_v27 = vpop.eup %2620 }
 0x1fb   : > { %v596_v28 = vmul.f32 %v2621_v27, %v580_v10  ;;  %v607_v32 = vadd.f32 %v2216_v30, %v601_v29 }
 0x1fd   : > { %v602_v31 = vmul.f32 %v2215_v26, %v596_v28 }
 0x1ff   : > { %v608_v33 = vadd.f32 %v2216_v30, %v602_v31 }
 0x201   : > { %v609_v34 = vpack.c.bf16 %v608_v33, %v607_v32 }
 0x203   : > { %2337 = vmatpush3.bf16.msra.mxu1 %v609_v34 }
 0x204   : > { %2342 = vmatprep.subr.bf16.mxu1 %v2922_v14 }
 0x206   : > { %2339 = vmatmul.mubr.msk.bf16.vlgmr.msra.gmra.mrb[0].mxu1 %vm615_vm4, %v3263_v35 }
 0x207   : > { %2343 = vmatpush3.bf16.msra.mxu1 %v2596_v36  ;;  %2346 = vmatprep.mubr.msk.bf16.mxu1 %vm2923_vm1, %v2922_v14 }
 0x208   : > { %2344 = vmatprep.subr.bf16.mxu1 %v2922_v14 }
 0x20b   : > { %2345 = vmatpush3.bf16.msra.mxu1 %v2597_v37 }
 0x20c   : > { %2356 = vmatprep.subr.bf16.mxu1 %v2922_v14 }
 0x20d   : > { %v903_v53 = vpop.permute.xlu0 %902 }
 0x20e   : > { %v908_v58 = vsel %vm615_vm4, %v903_v53, 0  ;;  %v2598_v53 = vld [vmem:[%s3570_s8] sm:$0xff]  }
 0x2d9   : > { %v653_v43 = vpop.f32.mrb[0].mxu1 }
 0x2da   : > { %v2340_v44 = vpop.f32.mrb[1].mxu1 }
 0x2db   : > { %v656_v45 = vpop.f32.mrb[2].mxu1 }
 0x2dc   : > { %v660_v46 = vpack.c.bf16 %v656_v45, %v653_v43  ;;  %v2341_v47 = vpop.f32.mrb[3].mxu1 }
 0x2de   : > { %2347 = vmatmul.mubr.msk.bf16.vlgmr.msra.gmra.mrb[4].mxu1 %vm569_vm0, %v660_v46 }
 0x2df   : > { %2358 = vmatprep.mubr.msk.bf16.mxu1 %vm2923_vm1, %v2922_v14  ;;  %2357 = vmatpush3.bf16.xpose.msra.mxu1 %v781_v48 }
 0x2e0   : > { %2368 = vmatprep.subr.bf16.mxu1 %v2922_v14 }
 0x3b1   : > { %v719_v50 = vpop.f32.mrb[4].mxu1 }
 0x3b2   : > { %v2348_v51 = vpop.f32.mrb[5].mxu1  ;;  %v720_v54 = vadd.f32 %v2219_v49, %v719_v50 }
 0x3b3   : > { %v722_v52 = vpop.f32.mrb[6].mxu1 }
 0x3b4   : > { %v723_v55 = vadd.f32 %v2219_v49, %v722_v52  ;;  %v2349_v56 = vpop.f32.mrb[7].mxu1 }
 0x3b5   : > { %v2599_v56 = vld [vmem:[%s3570_s8 + $0x8] sm:$0xff]  }
 0x3b6   : > { %v775_v57 = vpack.c.bf16 %v723_v55, %v720_v54 }
 0x3b8   : > { %900 = vrot.lane.b32.xlu1 %v775_v57, %s2924_s29  ;;  %2359 = vmatmul.mubr.msk.bf16.vlgmr.msra.gmra.mrb[8].mxu1 %vm615_vm4, %v775_v57 }
 0x3b9   : > { %2369 = vmatpush3.bf16.xpose.msra.mxu1 %v908_v58  ;;  %2370 = vmatprep.mubr.msk.bf16.mxu1 %vm2923_vm1, %v2922_v14 }
 0x3ba   : > { %2380 = vmatprep.subr.bf16.mxu1 %v2922_v14 }
 0x42a   : > { %v901_v59 = vpop.permute.xlu1 %900 }
 0x42b   : > { %2371 = vmatmul.mubr.msk.bf16.vlgmr.msra.gmra.mrb[12].mxu1 %vm615_vm4, %v901_v59 }
 0x42c   : > { %2384 = vmatprep.mubr.msk.bf16.mxu1 %vm2923_vm1, %v2922_v14  ;;  %2381 = vmatpush3.bf16.msra.mxu1 %v2598_v53 }
 0x42d   : > { %2382 = vmatprep.subr.bf16.mxu1 %v2922_v14 }
 0x430   : > { %2383 = vmatpush3.bf16.msra.mxu1 %v2599_v56 }
 0x431   : > { %2394 = vmatprep.subr.bf16.mxu1 %v2922_v14 }
 0x48b   : > { %v817_v60 = vpop.f32.mrb[8].mxu1 }
 0x48c   : > { %v2360_v61 = vpop.f32.mrb[9].mxu1  ;;  %v824_v62 = vsel %vm727_vm3, %v817_v60, -inf }
 0x48d   : > { %825 = vmax.xlane.f32.xlu1 %v824_v62  ;;  %v820_v63 = vpop.f32.mrb[10].mxu1 }
 0x48e   : > { %v2361_v2 = vpop.f32.mrb[11].mxu1  ;;  %v827_v3 = vsel %vm727_vm3, %v820_v63, -inf }
 0x48f   : > { %828 = vmax.xlane.f32.xlu0 %v827_v3 }
 0x4fe   : > { %v944_v4 = vpop.f32.mrb[12].mxu1 }
 0x4ff   : > { %v2372_v5 = vpop.f32.mrb[13].mxu1  ;;  %v951_v6 = vsel %vm727_vm3, %v944_v4, -inf }
 0x500   : > { %952 = vmax.xlane.f32.xlu0 %v951_v6  ;;  %v947_v7 = vpop.f32.mrb[14].mxu1 }
 0x501   : > { %v2373_v8 = vpop.f32.mrb[15].mxu1  ;;  %v954_v9 = vsel %vm727_vm3, %v947_v7, -inf }
 0x502   : > { %955 = vmax.xlane.f32.xlu1 %v954_v9  ;;  %v2231_v9 = vld [vmem:[#allocation9] ss:$0 sm:$0xff] }
 0x51a   : > { %v826_v10 = vpop.xlane.xlu1 %825 }
 0x51b   : > { %v830_v11 = vsub.f32 %v817_v60, %v826_v10 }
 0x51c   : > { %v829_v12 = vpop.xlane.xlu0 %828 }
 0x51d   : > { %v832_v13 = vmul.f32 1.442695, %v830_v11  ;;  %v831_v15 = vsub.f32 %v820_v63, %v829_v12 }
 0x51f   : > { %2622 = vpow2.f32 %v832_v13  ;;  %v834_v16 = vmul.f32 1.442695, %v831_v15 }
 0x521   : > { %2624 = vpow2.f32 %v834_v16 }
 0x529   : > { %v2623_v18 = vpop.eup %2622 }
 0x52a   : > { %v836_v19 = vsel %vm727_vm3, %v2623_v18, 0.0 }
 0x52b   : > { %v2625_v20 = vpop.eup %2624  ;;  %837 = vadd.xlane.f32.xlu0 %v836_v19 }
 0x52c   : > { %v839_v21 = vsel %vm727_vm3, %v2625_v20, 0.0 }
 0x52d   : > { %840 = vadd.xlane.f32.xlu1 %v839_v21 }
 0x58d   : > { %v953_v22 = vpop.xlane.xlu0 %952 }
 0x58e   : > { %v957_v23 = vsub.f32 %v944_v4, %v953_v22 }
 0x58f   : > { %v956_v24 = vpop.xlane.xlu1 %955 }
 0x590   : > { %v959_v25 = vmul.f32 1.442695, %v957_v23  ;;  %v958_v26 = vsub.f32 %v947_v7, %v956_v24 }
 0x592   : > { %2626 = vpow2.f32 %v959_v25  ;;  %v961_v27 = vmul.f32 1.442695, %v958_v26 }
 0x594   : > { %2628 = vpow2.f32 %v961_v27 }
 0x59c   : > { %v2627_v28 = vpop.eup %2626 }
 0x59d   : > { %v963_v29 = vsel %vm727_vm3, %v2627_v28, 0.0 }
 0x59e   : > { %v2629_v30 = vpop.eup %2628  ;;  %964 = vadd.xlane.f32.xlu0 %v963_v29 }
 0x59f   : > { %v966_v31 = vsel %vm727_vm3, %v2629_v30, 0.0 }
 0x5a0   : > { %967 = vadd.xlane.f32.xlu1 %v966_v31 }
 0x5b1   : > { %974 = vrot.lane.b32.xlu1 %v3278_v39, %s2925_s20 }
 0x5b4   : > { %848 = vrot.lane.b32.xlu0 %v3278_v39, %s2926_s28 }
 0x5b8   : > { %v838_v33 = vpop.xlane.xlu0 %837 }
 0x5ba   : > { %v841_v32 = vpop.xlane.xlu1 %840 }
 0x5bb   : > { %2630 = vrcp.f32 %v841_v32 }
 0x5bc   : > { %2632 = vrcp.f32 %v838_v33 }
 0x5c5   : > { %v2631_v34 = vpop.eup %2630 }
 0x5c6   : > { %v2633_v37 = vpop.eup %2632  ;;  %v845_v40 = vmul.f32 %v2631_v34, %v2625_v20 }
 0x5c7   : > { %v843_v42 = vmul.f32 %v2633_v37, %v2623_v18 }
 0x5c9   : > { %v846_v45 = vpack.c.bf16 %v845_v40, %v843_v42 }
 0x62b   : > { %v965_v36 = vpop.xlane.xlu0 %964 }
 0x62c   : > { %2634 = vrcp.f32 %v965_v36 }
 0x62d   : > { %v968_v38 = vpop.xlane.xlu1 %967 }
 0x62e   : > { %2636 = vrcp.f32 %v968_v38 }
 0x62f   : > { %v849_v41 = vpop.permute.xlu0 %848 }
 0x630   : > { %v854_v43 = vsel %vm731_vm2, %v849_v41, 0  ;;  %v2233_v41 = vld [vmem:[#allocation3 + $0x1] ss:$0 sm:$0xff] }
 0x631   : > { %2363 = vmatpush3.bf16.msra.mxu0 %v854_v43  ;;  %v975_v44 = vpop.permute.xlu1 %974 }
 0x632   : > { %2374 = vmatprep.subr.bf16.mxu0 %v2922_v14  ;;  %v980_v39 = vsel %vm731_vm2, %v975_v44, 0 }
 0x634   : > { %2365 = vmatmul.mubr.msk.bf16.vlgmr.msra.gmra.mrb[4].mxu0 %vm727_vm3, %v846_v45  ;;  %v2234_v45 = vld [vmem:[#allocation6 + $0x1] ss:$0 sm:$0xff] }
 0x635   : > { %2375 = vmatpush3.bf16.msra.mxu0 %v980_v39  ;;  %2376 = vmatprep.mubr.msk.bf16.mxu0 %vm2923_vm1, %v2922_v14 }
 0x636   : > { %v2635_v46 = vpop.eup %2634  ;;  %2388 = vmatprep.subr.bf16.mxu0 %v2922_v14 }
 0x637   : > { %v970_v48 = vmul.f32 %v2635_v46, %v2627_v28 }
 0x638   : > { %v2637_v47 = vpop.eup %2636 }
 0x639   : > { %v972_v49 = vmul.f32 %v2637_v47, %v2629_v30  ;;  %v2600_v30 = vld [vmem:[%s3567_s5 + $0x10] sm:$0xff]  }
 0x63b   : > { %v973_v50 = vpack.c.bf16 %v972_v49, %v970_v48  ;;  %v1296_v49 = vld [vmem:[#allocation8 + $0x4] sm:$0xf] }
 0x63d   : > { %2377 = vmatmul.mubr.msk.bf16.vlgmr.msra.gmra.mrb[8].mxu0 %vm727_vm3, %v973_v50  ;;  %v1298_v50 = vsel %vm731_vm2, %v1296_v49, 0 }
 0x63e   : > { %2390 = vmatprep.mubr.msk.bf16.mxu0 %vm2923_vm1, %v2922_v14 }
 0x707   : > { %v890_v51 = vpop.f32.mrb[4].mxu0 }
 0x708   : > { %897 = vst.msk [vmem:[#allocation2] sm:$0xff] %vm615_vm4, %v890_v51  ;;  %v2366_v52 = vpop.f32.mrb[5].mxu0  ;;  %v2601_v51 = vld [vmem:[%s3567_s5 + $0x18] sm:$0xff]  }
 0x709   : > { %v893_v54 = vpop.f32.mrb[6].mxu0 }
 0x70a   : > { %898 = vst.msk [vmem:[#allocation2 + $0x8] sm:$0xff] %vm615_vm4, %v893_v54  ;;  %v2367_v55 = vpop.f32.mrb[7].mxu0 }
 0x710   : > { %v1016_v57 = vpop.f32.mrb[8].mxu0 }
 0x711   : > { %1025 = vrot.lane.b32.xlu1 %v1016_v57, %s2927_s19  ;;  %v2378_v58 = vpop.f32.mrb[9].mxu0 }
 0x712   : > { %v1019_v59 = vpop.f32.mrb[10].mxu0 }
 0x713   : > { %v2379_v60 = vpop.f32.mrb[11].mxu0 }
 0x715   : > { %1027 = vrot.lane.b32.xlu1 %v1019_v59, %s2927_s19 }
 0x783   : > { %v1026_v61 = vpop.permute.xlu1 %1025 }
 0x784   : > { %1032 = vst.msk [vmem:[#allocation2] sm:$0xff] %vm1031_vm5, %v1026_v61 }
 0x787   : > { %v1028_v62 = vpop.permute.xlu1 %1027 }
 0x788   : > { %1033 = vst.msk [vmem:[#allocation2 + $0x8] sm:$0xff] %vm1031_vm5, %v1028_v62  ;;  %v2240_v62 = vld [vmem:[%s3568_s6 + $0x1] ss:$0 sm:$0xff] }
 0x78b   : > { %v1034_v63 = vld [vmem:[#allocation2] sm:$0xff] }
 0x78f   : > { %v1035_v2 = vld [vmem:[#allocation2 + $0x8] sm:$0xff] }
 0x790   : > { %v1041_v3 = vpack.c.bf16 %v1035_v2, %v1034_v63 }
 0x792   : > { %2385 = vmatmul.mubr.msk.bf16.vlgmr.msra.gmra.mrb[16].mxu1 %vm569_vm0, %v1041_v3 }
 0x793   : > { %2396 = vmatprep.mubr.msk.bf16.mxu1 %vm2923_vm1, %v2922_v14 }
 0x865   : > { %v1091_v4 = vpop.f32.mrb[16].mxu1 }
 0x866   : > { %v2386_v5 = vpop.f32.mrb[17].mxu1 }
 0x867   : > { %v1094_v6 = vpop.f32.mrb[18].mxu1 }
 0x868   : > { %v1098_v7 = vpack.c.bf16 %v1094_v6, %v1091_v4  ;;  %v2387_v8 = vpop.f32.mrb[19].mxu1 }
 0x86a   : > { %2389 = vmatpush3.bf16.msra.mxu0 %v1098_v7 }
 0x86b   : > { %2400 = vmatprep.subr.bf16.mxu0 %v2922_v14 }
 0x86d   : > { %2391 = vmatmul.mubr.msk.bf16.vlgmr.msra.gmra.mrb[12].mxu0 %vm615_vm4, %v3263_v35 }
 0x86e   : > { %2404 = vmatprep.mubr.msk.bf16.mxu0 %vm2923_vm1, %v2922_v14  ;;  %2401 = vmatpush3.bf16.msra.mxu0 %v2600_v30 }
 0x86f   : > { %2402 = vmatprep.subr.bf16.mxu0 %v2922_v14 }
 0x872   : > { %2403 = vmatpush3.bf16.msra.mxu0 %v2601_v51 }
 0x873   : > { %2414 = vmatprep.subr.bf16.mxu0 %v2922_v14 }
 0x940   : > { %v1137_v10 = vpop.f32.mrb[12].mxu0 }
 0x941   : > { %v1138_v11 = vadd.f32 %v2231_v9, %v1137_v10  ;;  %v2392_v12 = vpop.f32.mrb[13].mxu0 }
 0x942   : > { %v1140_v13 = vpop.f32.mrb[14].mxu0 }
 0x943   : > { %v3345_v15 = vadd.f32 %v1138_v11, %v3230_v0  ;;  %v1141_v16 = vadd.f32 %v2231_v9, %v1140_v13  ;;  %v2393_v18 = vpop.f32.mrb[15].mxu0 }
 0x945   : > { %v3348_v19 = vadd.f32 %v1141_v16, %v3232_v1  ;;  %v1148_v20 = vsel %vm569_vm0, %v3345_v15, 0.0 }
 0x946   : > { %1149 = vadd.xlane.f32.xlu0 %v1148_v20 }
 0x947   : > { %v1151_v21 = vsel %vm569_vm0, %v3348_v19, 0.0 }
 0x948   : > { %1152 = vadd.xlane.f32.xlu1 %v1151_v21 }
 0x9d3   : > { %v1150_v22 = vpop.xlane.xlu0 %1149 }
 0x9d4   : > { %v1154_v23 = vmul.f32 0.03125, %v1150_v22 }
 0x9d5   : > { %v1153_v24 = vpop.xlane.xlu1 %1152 }
 0x9d6   : > { %v1156_v25 = vsub.f32 %v3345_v15, %v1154_v23  ;;  %v1155_v0 = vmul.f32 0.03125, %v1153_v24 }
 0x9d8   : > { %v1157_v26 = vsub.f32 %v3348_v19, %v1155_v0  ;;  %v1158_v27 = vmul.f32 %v1156_v25, %v1156_v25 }
 0x9da   : > { %v1160_v1 = vsel %vm569_vm0, %v1158_v27, 0.0  ;;  %v1159_v28 = vmul.f32 %v1157_v26, %v1157_v26 }
 0x9db   : > { %1161 = vadd.xlane.f32.xlu0 %v1160_v1 }
 0x9dc   : > { %v1163_v29 = vsel %vm569_vm0, %v1159_v28, 0.0 }
 0x9df   : > { %1164 = vadd.xlane.f32.xlu0 %v1163_v29 }
 0xa68   : > { %v1162_v31 = vpop.xlane.xlu0 %1161 }
 0xa69   : > { %v1166_v32 = vmul.f32 0.03125, %v1162_v31 }
 0xa6b   : > { %v1168_v33 = vadd.f32 1e-05, %v1166_v32 }
 0xa6c   : > { %v1165_v34 = vpop.xlane.xlu0 %1164 }
 0xa6d   : > { %2638 = vrsqrt.f32 %v1168_v33  ;;  %v1167_v36 = vmul.f32 0.03125, %v1165_v34 }
 0xa6f   : > { %v1169_v37 = vadd.f32 1e-05, %v1167_v36 }
 0xa71   : > { %2640 = vrsqrt.f32 %v1169_v37 }
 0xa77   : > { %v2639_v38 = vpop.eup %2638 }
 0xa78   : > { %v1172_v40 = vmul.f32 %v2639_v38, %v1156_v25 }
 0xa7a   : > { %v1178_v44 = vmul.f32 %v2233_v41, %v1172_v40 }
 0xa7b   : > { %v2641_v42 = vpop.eup %2640 }
 0xa7c   : > { %v1173_v43 = vmul.f32 %v2641_v42, %v1157_v26  ;;  %v1184_v46 = vadd.f32 %v2234_v45, %v1178_v44 }
 0xa7e   : > { %v1179_v39 = vmul.f32 %v2233_v41, %v1173_v43 }
 0xa80   : > { %v1185_v47 = vadd.f32 %v2234_v45, %v1179_v39 }
 0xa82   : > { %v1186_v48 = vpack.c.bf16 %v1185_v47, %v1184_v46 }
 0xa84   : > { %2395 = vmatpush3.bf16.msra.mxu1 %v1186_v48 }
 0xa85   : > { %2408 = vmatprep.subr.bf16.mxu1 %v2922_v14 }
 0xa87   : > { %2397 = vmatmul.mubr.msk.bf16.vlgmr.msra.gmra.mrb[20].mxu1 %vm615_vm4, %v3263_v35 }
 0xa88   : > { %2409 = vmatpush3.bf16.msra.mxu1 %v1298_v50  ;;  %2410 = vmatprep.mubr.msk.bf16.mxu1 %vm2923_vm1, %v2922_v14 }
 0xa89   : > { %2420 = vmatprep.subr.bf16.mxu1 %v2922_v14 }
 0xa8f   : > { %2411 = vmatmul.mubr.msk.bf16.vlgmr.msra.gmra.mrb[24].mxu1 %vm727_vm3, %v3253_v17 }
 0xa90   : > { %2422 = vmatprep.mubr.msk.bf16.mxu1 %vm2923_vm1, %v2922_v14 }
 0xb5a   : > { %v1221_v52 = vpop.f32.mrb[20].mxu1 }
 0xb5b   : > { %v2398_v53 = vpop.f32.mrb[21].mxu1 }
 0xb5c   : > { %v1224_v54 = vpop.f32.mrb[22].mxu1 }
 0xb5d   : > { %v1228_v55 = vpack.c.bf16 %v1224_v54, %v1221_v52  ;;  %v2399_v56 = vpop.f32.mrb[23].mxu1 }
 0xb5f   : > { %2405 = vmatmul.mubr.msk.bf16.vlgmr.msra.gmra.mrb[16].mxu0 %vm569_vm0, %v1228_v55 }
 0xb60   : > { %2416 = vmatprep.mubr.msk.bf16.mxu0 %vm2923_vm1, %v2922_v14 }
 0xb62   : > { %v1334_v17 = vpop.f32.mrb[24].mxu1 }
 0xb63   : > { %v3380_v57 = vpack.c.bf16 %v1334_v17, %v1334_v17  ;;  %v2412_v58 = vpop.f32.mrb[25].mxu1 }
 0xb64   : > { %v1337_v59 = vpop.f32.mrb[26].mxu1 }
 0xb65   : > { %v2413_v60 = vpop.f32.mrb[27].mxu1  ;;  %1467 = vrot.lane.b32.xlu0 %v3380_v57, %s2924_s29  ;;  %v1346_v61 = vsel %vm615_vm4, %v3380_v57, 0 }
 0xb66   : > { %2415 = vmatpush3.bf16.xpose.msra.mxu0 %v1346_v61 }
 0xb67   : > { %2426 = vmatprep.subr.bf16.mxu0 %v2922_v14 }
 0xbd7   : > { %v1468_v4 = vpop.permute.xlu0 %1467 }
 0xbd8   : > { %v1473_v9 = vsel %vm615_vm4, %v1468_v4, 0 }
 0xc32   : > { %v1288_v63 = vpop.f32.mrb[16].mxu0 }
 0xc33   : > { %v2406_v2 = vpop.f32.mrb[17].mxu0  ;;  %v1289_v5 = vadd.f32 %v2240_v62, %v1288_v63 }
 0xc34   : > { %v1291_v3 = vpop.f32.mrb[18].mxu0 }
 0xc35   : > { %v1292_v6 = vadd.f32 %v2240_v62, %v1291_v3  ;;  %v2407_v7 = vpop.f32.mrb[19].mxu0  ;;  %v2602_v3 = vld [vmem:[%s3570_s8 + $0x10] sm:$0xff]  }
 0xc37   : > { %v1340_v8 = vpack.c.bf16 %v1292_v6, %v1289_v5  ;;  %v2603_v6 = vld [vmem:[%s3570_s8 + $0x18] sm:$0xff]  }
 0xc39   : > { %1465 = vrot.lane.b32.xlu1 %v1340_v8, %s2924_s29  ;;  %2417 = vmatmul.mubr.msk.bf16.vlgmr.msra.gmra.mrb[20].mxu0 %vm615_vm4, %v1340_v8 }
 0xc3a   : > { %2427 = vmatpush3.bf16.xpose.msra.mxu0 %v1473_v9  ;;  %2428 = vmatprep.mubr.msk.bf16.mxu0 %vm2923_vm1, %v2922_v14 }
 0xc3b   : > { %2438 = vmatprep.subr.bf16.mxu0 %v2922_v14 }
 0xcab   : > { %v1466_v10 = vpop.permute.xlu1 %1465 }
 0xcac   : > { %2429 = vmatmul.mubr.msk.bf16.vlgmr.msra.gmra.mrb[24].mxu0 %vm615_vm4, %v1466_v10 }
 0xcad   : > { %2442 = vmatprep.mubr.msk.bf16.mxu0 %vm2923_vm1, %v2922_v14  ;;  %2439 = vmatpush3.bf16.msra.mxu0 %v2602_v3 }
 0xcae   : > { %2440 = vmatprep.subr.bf16.mxu0 %v2922_v14 }
 0xcb1   : > { %2441 = vmatpush3.bf16.msra.mxu0 %v2603_v6 }
 0xcb2   : > { %2452 = vmatprep.subr.bf16.mxu0 %v2922_v14 }
 0xd0c   : > { %v1382_v11 = vpop.f32.mrb[20].mxu0 }
 0xd0d   : > { %v2418_v12 = vpop.f32.mrb[21].mxu0  ;;  %v1389_v13 = vsel %vm727_vm3, %v1382_v11, -inf }
 0xd0e   : > { %1390 = vmax.xlane.f32.xlu1 %v1389_v13  ;;  %v1385_v16 = vpop.f32.mrb[22].mxu0 }
 0xd0f   : > { %v2419_v18 = vpop.f32.mrb[23].mxu0  ;;  %v1392_v20 = vsel %vm727_vm3, %v1385_v16, -inf }
 0xd10   : > { %1393 = vmax.xlane.f32.xlu0 %v1392_v20 }
 0xd7f   : > { %v1509_v21 = vpop.f32.mrb[24].mxu0 }
 0xd80   : > { %v2430_v22 = vpop.f32.mrb[25].mxu0  ;;  %v1516_v23 = vsel %vm727_vm3, %v1509_v21, -inf }
 0xd81   : > { %1517 = vmax.xlane.f32.xlu0 %v1516_v23  ;;  %v1512_v24 = vpop.f32.mrb[26].mxu0 }
 0xd82   : > { %v2431_v25 = vpop.f32.mrb[27].mxu0  ;;  %v1519_v0 = vsel %vm727_vm3, %v1512_v24, -inf }
 0xd83   : > { %1520 = vmax.xlane.f32.xlu1 %v1519_v0  ;;  %v2256_v25 = vld [vmem:[#allocation9 + $0x1] ss:$0 sm:$0xff] }
 0xd9b   : > { %v1391_v26 = vpop.xlane.xlu1 %1390 }
 0xd9c   : > { %v1395_v27 = vsub.f32 %v1382_v11, %v1391_v26 }
 0xd9d   : > { %v1394_v1 = vpop.xlane.xlu0 %1393 }
 0xd9e   : > { %v1397_v28 = vmul.f32 1.442695, %v1395_v27  ;;  %v1396_v29 = vsub.f32 %v1385_v16, %v1394_v1 }
 0xda0   : > { %2642 = vpow2.f32 %v1397_v28  ;;  %v1399_v30 = vmul.f32 1.442695, %v1396_v29 }
 0xda2   : > { %2644 = vpow2.f32 %v1399_v30 }
 0xdaa   : > { %v2643_v31 = vpop.eup %2642 }
 0xdab   : > { %v1401_v32 = vsel %vm727_vm3, %v2643_v31, 0.0 }
 0xdac   : > { %v2645_v33 = vpop.eup %2644  ;;  %1402 = vadd.xlane.f32.xlu0 %v1401_v32 }
 0xdad   : > { %v1404_v34 = vsel %vm727_vm3, %v2645_v33, 0.0 }
 0xdae   : > { %1405 = vadd.xlane.f32.xlu1 %v1404_v34 }
 0xe0e   : > { %v1518_v36 = vpop.xlane.xlu0 %1517 }
 0xe0f   : > { %v1522_v37 = vsub.f32 %v1509_v21, %v1518_v36 }
 0xe10   : > { %v1521_v38 = vpop.xlane.xlu1 %1520 }
 0xe11   : > { %v1524_v40 = vmul.f32 1.442695, %v1522_v37  ;;  %v1523_v41 = vsub.f32 %v1512_v24, %v1521_v38 }
 0xe13   : > { %2646 = vpow2.f32 %v1524_v40  ;;  %v1526_v42 = vmul.f32 1.442695, %v1523_v41 }
 0xe15   : > { %2648 = vpow2.f32 %v1526_v42 }
 0xe1d   : > { %v2647_v43 = vpop.eup %2646 }
 0xe1e   : > { %v1528_v44 = vsel %vm727_vm3, %v2647_v43, 0.0 }
 0xe1f   : > { %v2649_v45 = vpop.eup %2648  ;;  %1529 = vadd.xlane.f32.xlu0 %v1528_v44  ;;  %v2604_v44 = vld [vmem:[%s3572_s10] ss:$8 sps:$4 sm:$0xff]  }
 0xe20   : > { %v1531_v39 = vsel %vm727_vm3, %v2649_v45, 0.0 }
 0xe21   : > { %1532 = vadd.xlane.f32.xlu1 %v1531_v39 }
 0xe32   : > { %1539 = vrot.lane.b32.xlu1 %v3380_v57, %s2925_s20  ;;  %s2834_s20 = scalar_lea.vmem %s3516_s24, 256 }
 0xe33   : > { %p2835_p4 = scmp.ne.s32.totalorder %s3516_s24, %s2834_s20 }
 0xe35   : > { %1413 = vrot.lane.b32.xlu0 %v3380_v57, %s2926_s28  ;;  %p2836_p8 = pnand %p2835_p4, %p3617_p7  ;;  %s2929_s28 = smov [#allocation14]  }
 0xe36   : > { %s2838_s21 = sshll.u32 %s2929_s28, 4  ;;  %s2839_s21 = int_to_ptr.vmem [resolvable:$false] %s2838_s21 }
 0xe37   : > { %p2837_p11 = pneg %p2836_p8  ;;  %s2840_s3 = scalar_lea.vmem %s2839_s21, 512 }
 0xe38   : > { %p2841_p13 = scmp.lt.s32.totalorder %s3516_s24, %s2839_s21  ;;  %p2842_p0 = scmp.lt.s32.totalorder %s2840_s3, %s2834_s20 }
 0xe39   : > { %v1403_v47 = vpop.xlane.xlu0 %1402 }
 0xe3a   : > { %p2843_p1 = por %p2842_p0, %p2841_p13 }
 0xe3b   : > { %v1406_v46 = vpop.xlane.xlu1 %1405 }
 0xe3c   : > { %2650 = vrcp.f32 %v1406_v46  ;;  %p2844_p6 = pnand %p2843_p1, %p2837_p11 }
 0xe3d   : > { %2652 = vrcp.f32 %v1403_v47 }
 0xe46   : > { %v2651_v48 = vpop.eup %2650 }
 0xe47   : > { %v2653_v50 = vpop.eup %2652  ;;  %v1410_v52 = vmul.f32 %v2651_v48, %v2645_v33 }
 0xe48   : > { %v1408_v54 = vmul.f32 %v2653_v50, %v2643_v31 }
 0xe4a   : > { %v1411_v17 = vpack.c.bf16 %v1410_v52, %v1408_v54 }
 0xeac   : > { %v1530_v49 = vpop.xlane.xlu0 %1529 }
 0xead   : > { %2654 = vrcp.f32 %v1530_v49 }
 0xeae   : > { %v1533_v51 = vpop.xlane.xlu1 %1532 }
 0xeaf   : > { %2656 = vrcp.f32 %v1533_v51 }
 0xeb0   : > { %v1414_v53 = vpop.permute.xlu0 %1413 }
 0xeb1   : > { %v1419_v55 = vsel %vm731_vm2, %v1414_v53, 0  ;;  %v2258_v53 = vld [vmem:[#allocation3 + $0x2] ss:$0 sm:$0xff] }
 0xeb2   : > { %2421 = vmatpush3.bf16.msra.mxu1 %v1419_v55  ;;  %v1540_v56 = vpop.permute.xlu1 %1539 }
 0xeb3   : > { %2432 = vmatprep.subr.bf16.mxu1 %v2922_v14  ;;  %v1545_v57 = vsel %vm731_vm2, %v1540_v56, 0 }
 0xeb5   : > { %2423 = vmatmul.mubr.msk.bf16.vlgmr.msra.gmra.mrb[28].mxu1 %vm727_vm3, %v1411_v17  ;;  %v2259_v17 = vld [vmem:[#allocation6 + $0x2] ss:$0 sm:$0xff] }
 0xeb6   : > { %2433 = vmatpush3.bf16.msra.mxu1 %v1545_v57  ;;  %2434 = vmatprep.mubr.msk.bf16.mxu1 %vm2923_vm1, %v2922_v14 }
 0xeb7   : > { %v2655_v58 = vpop.eup %2654  ;;  %2446 = vmatprep.subr.bf16.mxu1 %v2922_v14 }
 0xeb8   : > { %v1535_v60 = vmul.f32 %v2655_v58, %v2647_v43 }
 0xeb9   : > { %v2657_v59 = vpop.eup %2656 }
 0xeba   : > { %v1537_v61 = vmul.f32 %v2657_v59, %v2649_v45  ;;  %v2606_v45 = vld [vmem:[%s3572_s10 + $0x4] ss:$8 sps:$4 sm:$0xff]  }
 0xebc   : > { %v1538_v62 = vpack.c.bf16 %v1537_v61, %v1535_v60  ;;  %v2609_v61 = vld [vmem:[%s3572_s10 + $0x14] ss:$8 sps:$4 sm:$0xff]  }
 0xebe   : > { %2435 = vmatmul.mubr.msk.bf16.vlgmr.msra.gmra.mrb[32].mxu1 %vm727_vm3, %v1538_v62  ;;  %v2607_v62 = vld [vmem:[%s3572_s10 + $0x10] ss:$8 sps:$4 sm:$0xff]  }
 0xebf   : > { %2448 = vmatprep.mubr.msk.bf16.mxu1 %vm2923_vm1, %v2922_v14 }
 0xf88   : > { %v1455_v63 = vpop.f32.mrb[28].mxu1 }
 0xf89   : > { %1462 = vst.msk [vmem:[#allocation2] sm:$0xff] %vm615_vm4, %v1455_v63  ;;  %v2424_v2 = vpop.f32.mrb[29].mxu1  ;;  %v2928_v63 = vmov 0  }
 0xf8a   : > { %v1458_v4 = vpop.f32.mrb[30].mxu1  ;;  %v2610_v2 = vld [vmem:[%s3574_s12] sm:$0xff]  }
 0xf8b   : > { %1463 = vst.msk [vmem:[#allocation2 + $0x8] sm:$0xff] %vm615_vm4, %v1458_v4  ;;  %v2425_v5 = vpop.f32.mrb[31].mxu1 }
 0xf91   : > { %v1581_v7 = vpop.f32.mrb[32].mxu1 }
 0xf92   : > { %1590 = vrot.lane.b32.xlu1 %v1581_v7, %s2927_s19  ;;  %v2436_v8 = vpop.f32.mrb[33].mxu1 }
 0xf93   : > { %v1584_v9 = vpop.f32.mrb[34].mxu1  ;;  %v2611_v8 = vld [vmem:[%s3574_s12 + $0x8] sm:$0xff]  }
 0xf94   : > { %v2437_v10 = vpop.f32.mrb[35].mxu1 }
 0xf95   : > { %v2613_v10 = vld [vmem:[%s3574_s12 + $0x18] sm:$0xff]  }
 0xf96   : > { %1592 = vrot.lane.b32.xlu1 %v1584_v9, %s2927_s19  ;;  %v2612_v9 = vld [vmem:[%s3574_s12 + $0x10] sm:$0xff]  }
0x1004   : > { %v1591_v11 = vpop.permute.xlu1 %1590 }
0x1005   : > { %1596 = vst.msk [vmem:[#allocation2] sm:$0xff] %vm1031_vm5, %v1591_v11  ;;  %v2614_v11 = vld [vmem:[%s3574_s12 + $0x20] sm:$0xff]  }
0x1008   : > { %v1593_v12 = vpop.permute.xlu1 %1592 }
0x1009   : > { %1597 = vst.msk [vmem:[#allocation2 + $0x8] sm:$0xff] %vm1031_vm5, %v1593_v12  ;;  %v2615_v12 = vld [vmem:[%s3574_s12 + $0x28] sm:$0xff]  }
0x100c   : > { %v1598_v13 = vld [vmem:[#allocation2] sm:$0xff] }
0x1010   : > { %v1599_v16 = vld [vmem:[#allocation2 + $0x8] sm:$0xff] }
0x1011   : > { %v1606_v18 = vpack.c.bf16 %v1599_v16, %v1598_v13  ;;  %v2616_v13 = vld [vmem:[%s3574_s12 + $0x30] sm:$0xff]   ;;  %v2617_v16 = vld [vmem:[%s3574_s12 + $0x38] sm:$0xff]  }
0x1013   : > { %2443 = vmatmul.mubr.msk.bf16.vlgmr.msra.gmra.mrb[28].mxu0 %vm569_vm0, %v1606_v18  ;;  %v1817_v18 = vlaneseq }
0x1014   : > { %2454 = vmatprep.mubr.msk.bf16.mxu0 %vm2923_vm1, %v2922_v14 }
0x10e6   : > { %v1656_v20 = vpop.f32.mrb[28].mxu0 }
0x10e7   : > { %v2444_v21 = vpop.f32.mrb[29].mxu0 }
0x10e8   : > { %v1659_v22 = vpop.f32.mrb[30].mxu0 }
0x10e9   : > { %v1663_v23 = vpack.c.bf16 %v1659_v22, %v1656_v20  ;;  %v2445_v24 = vpop.f32.mrb[31].mxu0  ;;  %v1818_v20 = vshrl.u32 %v1817_v18, 7  ;;  %v1717_v22 = vld [vmem:[#allocation11] sm:$0x3] }
0x10eb   : > { %2447 = vmatpush3.bf16.msra.mxu1 %v1663_v23  ;;  %v1823_v21 = vsub.s32 1, %v1818_v20 }
0x10ec   : > { %1850 = vmatprep.subr.bf16.mxu1 %v2606_v45 }
0x10ed   : > { %v1824_v23 = vrot.slane %v1717_v22, %v1823_v21 }
0x10ee   : > { %2449 = vmatmul.mubr.msk.bf16.vlgmr.msra.gmra.mrb[36].mxu1 %vm615_vm4, %v3263_v35 }
0x10ef   : > { %1851 = vmatpush1.bf16.msra.mxu1 %v2604_v44  ;;  %1882 = vmatprep.mubr.bf16.mxu1 %v2928_v63 }
0x10f0   : > { %1852 = vmatprep.subr.bf16.mxu1 %v2609_v61 }
0x10f3   : > { %1853 = vmatpush1.bf16.msra.mxu1 %v2607_v62 }
0x10f4   : > { %2478 = vmatprep.subr.bf16.mxu1 %v2922_v14 }
0x11c1   : > { %v1702_v0 = vpop.f32.mrb[36].mxu1 }
0x11c2   : > { %v1703_v26 = vadd.f32 %v2256_v25, %v1702_v0  ;;  %v2450_v27 = vpop.f32.mrb[37].mxu1 }
0x11c3   : > { %v1705_v1 = vpop.f32.mrb[38].mxu1 }
0x11c4   : > { %v3441_v28 = vadd.f32 %v1703_v26, %v3345_v15  ;;  %v1706_v29 = vadd.f32 %v2256_v25, %v1705_v1  ;;  %v2451_v30 = vpop.f32.mrb[39].mxu1 }
0x11c6   : > { %v3444_v31 = vadd.f32 %v1706_v29, %v3348_v19  ;;  %v1735_v32 = vsel %vm569_vm0, %v3441_v28, 0.0 }
0x11c7   : > { %1736 = vadd.xlane.f32.xlu0 %v1735_v32 }
0x11c8   : > { %v1738_v33 = vsel %vm569_vm0, %v3444_v31, 0.0 }
0x11c9   : > { %1739 = vadd.xlane.f32.xlu1 %v1738_v33 }
0x1254   : > { %v1737_v34 = vpop.xlane.xlu0 %1736 }
0x1255   : > { %v1741_v36 = vmul.f32 0.03125, %v1737_v34 }
0x1256   : > { %v1740_v37 = vpop.xlane.xlu1 %1739 }
0x1257   : > { %v1743_v38 = vsub.f32 %v3441_v28, %v1741_v36  ;;  %v1742_v15 = vmul.f32 0.03125, %v1740_v37 }
0x1259   : > { %v1744_v40 = vsub.f32 %v3444_v31, %v1742_v15  ;;  %v1745_v41 = vmul.f32 %v1743_v38, %v1743_v38 }
0x125b   : > { %v1747_v19 = vsel %vm569_vm0, %v1745_v41, 0.0  ;;  %v1746_v42 = vmul.f32 %v1744_v40, %v1744_v40 }
0x125c   : > { %1748 = vadd.xlane.f32.xlu0 %v1747_v19 }
0x125d   : > { %v1750_v43 = vsel %vm569_vm0, %v1746_v42, 0.0 }
0x1260   : > { %1751 = vadd.xlane.f32.xlu0 %v1750_v43 }
0x12e9   : > { %v1749_v39 = vpop.xlane.xlu0 %1748 }
0x12ea   : > { %v1753_v46 = vmul.f32 0.03125, %v1749_v39 }
0x12ec   : > { %v1755_v47 = vadd.f32 1e-05, %v1753_v46 }
0x12ed   : > { %v1752_v48 = vpop.xlane.xlu0 %1751 }
0x12ee   : > { %2658 = vrsqrt.f32 %v1755_v47  ;;  %v1754_v49 = vmul.f32 0.03125, %v1752_v48 }
0x12f0   : > { %v1756_v50 = vadd.f32 1e-05, %v1754_v49 }
0x12f2   : > { %2660 = vrsqrt.f32 %v1756_v50  ;;  %v2274_v50 = vld [vmem:[#allocation12] ss:$0 sm:$0xff] }
0x12f8   : > { %v2659_v51 = vpop.eup %2658 }
0x12f9   : > { %v1759_v52 = vmul.f32 %v2659_v51, %v1743_v38 }
0x12fb   : > { %v1765_v56 = vmul.f32 %v2258_v53, %v1759_v52 }
0x12fc   : > { %v2661_v54 = vpop.eup %2660 }
0x12fd   : > { %v1760_v55 = vmul.f32 %v2661_v54, %v1744_v40  ;;  %v1771_v58 = vadd.f32 %v2259_v17, %v1765_v56 }
0x12ff   : > { %v1766_v57 = vmul.f32 %v2258_v53, %v1760_v55 }
0x1301   : > { %v1772_v59 = vadd.f32 %v2259_v17, %v1766_v57 }
0x1303   : > { %v1773_v60 = vpack.c.bf16 %v1772_v59, %v1771_v58 }
0x1305   : > { %2453 = vmatpush3.bf16.msra.mxu0 %v1773_v60 }
0x1306   : > { %2458 = vmatprep.subr.bf16.mxu0 %v2922_v14 }
0x1308   : > { %2455 = vmatmul.mubr.msk.bf16.vlgmr.msra.gmra.mrb[32].mxu0 %vm615_vm4, %v3263_v35 }
0x1309   : > { %2474 = vmatprep.mubr.msk.bf16.mxu0 %vm2923_vm1, %v2922_v14  ;;  %2459 = vmatpush3.bf16.msra.mxu0 %v2610_v2 }
0x130a   : > { %2460 = vmatprep.subr.bf16.mxu0 %v2922_v14 }
0x130d   : > { %2461 = vmatpush3.bf16.msra.mxu0 %v2611_v8 }
0x130e   : > { %2462 = vmatprep.subr.bf16.mxu0 %v2922_v14 }
0x1311   : > { %2463 = vmatpush3.bf16.msra.mxu0 %v2612_v9 }
0x1312   : > { %2464 = vmatprep.subr.bf16.mxu0 %v2922_v14 }
0x1315   : > { %2465 = vmatpush3.bf16.msra.mxu0 %v2613_v10 }
0x1316   : > { %2466 = vmatprep.subr.bf16.mxu0 %v2922_v14 }
0x1319   : > { %2467 = vmatpush3.bf16.msra.mxu0 %v2614_v11 }
0x131a   : > { %2468 = vmatprep.subr.bf16.mxu0 %v2922_v14 }
0x131d   : > { %2469 = vmatpush3.bf16.msra.mxu0 %v2615_v12 }
0x131e   : > { %2470 = vmatprep.subr.bf16.mxu0 %v2922_v14 }
0x1321   : > { %2471 = vmatpush3.bf16.msra.mxu0 %v2616_v13 }
0x1322   : > { %2472 = vmatprep.subr.bf16.mxu0 %v2922_v14 }
0x1325   : > { %2473 = vmatpush3.bf16.msra.mxu0 %v2617_v16 }
0x13db   : > { %v1808_v3 = vpop.f32.mrb[32].mxu0 }
0x13dc   : > { %v2456_v4 = vpop.f32.mrb[33].mxu0 }
0x13dd   : > { %v1811_v5 = vpop.f32.mrb[34].mxu0 }
0x13de   : > { %v1815_v6 = vpack.c.bf16 %v1811_v5, %v1808_v3  ;;  %v2457_v7 = vpop.f32.mrb[35].mxu0 }
0x13e0   : > { %2265 = vmatmul.mubr.msk.bf16.vlgmr.msra.gmra.mrb[40].mxu1 %vm569_vm0, %v1815_v6 }
0x13e1   : > { %2480 = vmatprep.mubr.msk.bf16.mxu1 %vm2923_vm1, %v2922_v14  ;;  %v1819_v14 = vsub.s32 0, %v1818_v20 }
0x13e3   : > { %v1820_v32 = vrot.slane %v1717_v22, %v1819_v14 }
0x14b3   : > { %v1884_v24 = vpop.f32.mrb[40].mxu1 }
0x14b4   : > { %v1886_v25 = vpop.f32.mrb[41].mxu1  ;;  %v1885_v38 = vadd.f32 %v1884_v24, %v1820_v32 }
0x14b5   : > { %v1887_v0 = vadd.f32 %v1886_v25, %v1824_v23  ;;  %v1888_v26 = vpop.f32.mrb[42].mxu1 }
0x14b6   : > { %v1890_v27 = vpop.f32.mrb[43].mxu1  ;;  %v1889_v42 = vadd.f32 %v1888_v26, %v1820_v32 }
0x14b7   : > { %v1895_v1 = vmul.f32 0.70710677, %v1887_v0  ;;  %v1891_v29 = vadd.f32 %v1890_v27, %v1824_v23  ;;  %v1893_v34 = vmul.f32 0.5, %v1887_v0 }
0x14b9   : > { %2662 = verf.f32 %v1895_v1  ;;  %v1896_v30 = vmul.f32 0.70710677, %v1891_v29  ;;  %v1894_v40 = vmul.f32 0.5, %v1891_v29 }
0x14bb   : > { %2664 = verf.f32 %v1896_v30 }
0x14c3   : > { %v2663_v33 = vpop.eup %2662 }
0x14c4   : > { %v1899_v36 = vadd.f32 1.0, %v2663_v33 }
0x14c5   : > { %v2665_v37 = vpop.eup %2664 }
0x14c6   : > { %v1901_v15 = vmul.f32 %v1899_v36, %v1893_v34  ;;  %v1900_v41 = vadd.f32 1.0, %v2665_v37 }
0x14c8   : > { %v1903_v19 = vmul.f32 %v1901_v15, %v1885_v38  ;;  %v1902_v43 = vmul.f32 %v1900_v41, %v1894_v40 }
0x14ca   : > { %v1904_v44 = vmul.f32 %v1902_v43, %v1889_v42 }
0x14cc   : > { %v1905_v45 = vpack.c.bf16 %v1904_v44, %v1903_v19 }
0x14ce   : > { %2475 = vmatmul.mubr.bf16.vlgmr.msra.gmra.mrb[36].mxu0 %v1905_v45 }
0x15a1   : > { %v1988_v39 = vpop.f32.mrb[36].mxu0 }
0x15a2   : > { %v2476_v46 = vpop.f32.mrb[37].mxu0 }
0x15a3   : > { %v1991_v47 = vpop.f32.mrb[38].mxu0 }
0x15a4   : > { %v1995_v48 = vpack.c.bf16 %v1991_v47, %v1988_v39  ;;  %v2477_v49 = vpop.f32.mrb[39].mxu0 }
0x15a6   : > { %2479 = vmatpush3.bf16.msra.mxu1 %v1995_v48 }
0x15a9   : > { %2481 = vmatmul.mubr.msk.bf16.vlgmr.msra.gmra.mrb[44].mxu1 %vm615_vm4, %v3263_v35 }
0x167c   : > { %v2036_v51 = vpop.f32.mrb[44].mxu1 }
0x167d   : > { %v2037_v52 = vadd.f32 %v2274_v50, %v2036_v51  ;;  %v2482_v53 = vpop.f32.mrb[45].mxu1 }
0x167e   : > { %v2039_v54 = vpop.f32.mrb[46].mxu1 }
0x167f   : > { %v2043_v55 = vadd.f32 %v2037_v52, %v3441_v28  ;;  %v2040_v56 = vadd.f32 %v2274_v50, %v2039_v54  ;;  %v2483_v17 = vpop.f32.mrb[47].mxu1 }
0x1681   : > { %2045 = vst.msk [vmem:[%s551_s22] sm:$0xff] %vm569_vm0, %v2043_v55  ;;  %v2044_v35 = vadd.f32 %v2040_v56, %v3444_v31 }
0x1683   : > { %2046 = vst.msk [vmem:[%s551_s22 + $0x8] sm:$0xff] %vm569_vm0, %v2044_v35 }
0x1684   : > { %2847 = shalt.err (!%p2844_p6)
}
0x1685   : > { %s2848_s4 = scalar_lea.hbm %s3514_s25, 256  ;;  %s2852_s16 = scalar_lea.hbm %s3616_s27, 512 }
0x1686   : > { %p2849_p5 = scmp.ne.s32.totalorder %s3514_s25, %s2848_s4  ;;  %p2853_p10 = scmp.lt.u32.totalorder %s3514_s25, %s3616_s27 }
0x1687   : > { %p2854_p2 = scmp.lt.u32.totalorder %s2852_s16, %s2848_s4  ;;  %p2856_p4 = scmp.lt.u32.totalorder %s2848_s4, %s3514_s25 }
0x1688   : > { %p2850_p9 = pnand %p2849_p5, %p3617_p7 }
0x1689   : > { %p2855_p3 = por %p2854_p2, %p2853_p10 }
0x168a   : > { %p2851_p12 = pneg %p2850_p9 }
0x168b   : > { %p2857_p8 = por %p2856_p4, %p2855_p3 }
0x168d   : > { %p2858_p11 = pnand %p2857_p8, %p2851_p12 }
0x168f   : > { %2861 = shalt.err (!%p2858_p11)
}
0x1690   : > { %s2930_s22 = smov 128   ;;  %s2931_s23 = smov 8  }
0x1691   : > { %2508 = dma.vmem_to_hbm [thread:$0]  (%p3617_p7), %s3516_s24, 256, %s3514_s25, %s3521_s17, %s2930_s22, %s2930_s22, %s2931_s23  }
0x1692 PF: > { %s3618_s29 = sld [smem:[#allocation22_spill]]  ;;  %s3619_s20 = sld [smem:[#allocation20_spill]] }
0x1693   : > { %s3620_s28 = sld [smem:[#allocation26_spill]] }
0x1698   : > { %p2545_p13 = scmp.ge.s32.totalorder %s3618_s29, 2  ;;  %s2076_s21 = sand.u32 1, %s3619_s20  }
0x1699   : > { %p3621_p0 = scmp.ne.s32.totalorder %s3620_s28, 0  ;;  %s2077_s3 = scalar_lea.sflag [#allocation5], %s2076_s21 }
0x169b   : > { %p2530_p1 = pnand %p2545_p13, %p3621_p0 }
0x169d   : > { %2895 = dma.done.wait (!%p2530_p1), %s2077_s3, 256  }
0x169e   : > { %2897 = vsyncadd (!%p2530_p1), %s2077_s3, 4294967040  ;;  %s3622_s16 = sld [smem:[#allocation23_spill]]  ;;  %s3623_s4 = sld [smem:[#allocation21_spill]] }
0x169f   : > { %s3624_s15 = sld [smem:[#allocation24_spill]]  ;;  %s3625_s29 = smov %s2904_s30 }
0x16a4   : > { %p28_p6 = scmp.ge.s32.totalorder %s3622_s16, 4   ;;  %s3626_s30 = smov %s3623_s4 }
0x16a6   :  { %30 = sbr.rel (!%p28_p6) target bundleno = 11 (0xb), region = 142 }
0x16ad   :  { %2082 = vsyncpa [#allocation4], 1 }
0x16ae   :  { %2084 = vsyncpa [#allocation4 + $0x1], 1 }
0x16af   :  { %2085 = vsyncpa [#allocation7], 1 }
0x16b0   :  { %2086 = vsyncpa [#allocation10], 1 }
0x16b1   :  { %2087 = vsyncpa [#allocation13], 1 }
0x16b2   :  { %2088 = vsyncpa [#allocation5], 1 }
0x16b3   :  { %2090 = vsyncpa [#allocation5 + $0x1], 1 }

</bundles_post_ra>
